<compile_context>
chip_gen: v5e
topology: v5e:2x2
jax: 0.10.0
libtpu: 0.0.40
codegen_flags: <defaults>
</compile_context>

<pallas_src>
import functools

import jax
import jax.numpy as jnp
from jax.experimental import pallas as pl
from jax.experimental.pallas import tpu as pltpu


def _round_up(x: int, m: int) -> int:
    return (x + m - 1) // m * m


def _lstm_recurrence_kernel(gates_x_ref, len_ref, w_hh_ref, out_ref, h_ref, c_ref):
    """One grid step = T_BLK time steps of the LSTM recurrence for one batch tile.

    gates_x_ref: (T_BLK, B_BLK, 4H) precomputed x @ W_ih + (b_ih + b_hh), time-major
    len_ref:     (B_BLK, 1) int32   per-sequence lengths (0 on padded batch rows)
    w_hh_ref:    (H, 4H)            VMEM-resident recurrent weight
    out_ref:     (B_BLK, T_BLK, H)  batch-first output block
    h_ref, c_ref:(B_BLK, H)         VMEM scratch, carried across the time grid axis
    """
    # Zero-init the recurrent state at the first time block of each batch tile.
    @pl.when(pl.program_id(1) == 0)
    def _():
        h_ref[...] = jnp.zeros_like(h_ref)
        c_ref[...] = jnp.zeros_like(c_ref)

    w_hh = w_hh_ref[...]                 # loaded once per block (VMEM-resident)
    lengths = len_ref[...]               # (B_BLK, 1) int32
    t_blk = gates_x_ref.shape[0]
    hidden = h_ref.shape[-1]
    t0 = pl.program_id(1) * t_blk        # global time offset of this block

    def sigmoid(z):
        # Single EUP tanh instead of exp + divide; EUP has one VLIW slot and this
        # sits on the fully serial recurrence path.
        return 0.5 * jnp.tanh(0.5 * z) + 0.5

    h = h_ref[...]
    c = c_ref[...]
    # Static unroll: all ref indices (leading time index of gates_x, middle time
    # index of the batch-first output) are compile-time constants.
    for t in range(t_blk):
        # Fused 4-gate recurrent matmul: (B, H) @ (H, 4H) -> (B, 4H), f32 accum.
        gates = gates_x_ref[t].astype(jnp.float32) + jnp.dot(
            h, w_hh, preferred_element_type=jnp.float32)
        i = sigmoid(gates[:, 0 * hidden:1 * hidden])
        f = sigmoid(gates[:, 1 * hidden:2 * hidden])
        g = jnp.tanh(gates[:, 2 * hidden:3 * hidden])
        o = sigmoid(gates[:, 3 * hidden:4 * hidden])
        c_cand = f * c + i * g
        h_cand = o * jnp.tanh(c_cand)

        m = lengths > (t0 + t)           # (B_BLK, 1) bool, broadcasts over lanes
        # Padded positions: output exact zero, recurrent state frozen (vsel only).
        out_ref[:, t, :] = jnp.where(m, h_cand, 0.0)
        h = jnp.where(m, h_cand, h)
        c = jnp.where(m, c_cand, c)

    h_ref[...] = h
    c_ref[...] = c


@functools.partial(jax.jit, static_argnames=("t_blk", "b_blk", "gates_dtype"))
def lstm_seq2seq_forward(x, mask, w_ih, w_hh, b_ih, b_hh, *, t_blk=8, b_blk=None,
                         gates_dtype=jnp.float32):
    """PytorchSeq2SeqWrapper(nn.LSTM(batch_first=True)).forward(inputs, mask).

    x:    (B, T, D) float32
    mask: (B, T)    bool (left-aligned; lengths = mask.sum(1))
    w_ih: (D, 4H), w_hh: (H, 4H), b_ih/b_hh: (4H,)   gate order: i, f, g, o
    Returns (B, T, H) float32 in the original batch order.
    """
    batch, seq, _ = x.shape
    hidden = w_hh.shape[0]

    # Sublane-friendly padded batch; optional batch tiling (parallel grid axis).
    b_pad = _round_up(max(batch, 8), 8)
    if b_blk is None:
        b_blk = b_pad
    else:
        b_blk = _round_up(min(b_blk, b_pad), 8)
        b_pad = _round_up(b_pad, b_blk)
    t_pad = _round_up(seq, t_blk)

    x_p = jnp.pad(x, ((0, b_pad - batch), (0, t_pad - seq), (0, 0)))

    # Per-sequence lengths; padded batch rows get length 0 (-> zero output).
    lengths = jnp.sum(mask.astype(jnp.int32), axis=1)
    lengths_p = jnp.pad(lengths, (0, b_pad - batch))[:, None]           # (b_pad, 1)

    # Hoisted input projection: one big GEMM, emitted TIME-MAJOR directly so no
    # separate HBM transpose pass is needed before the kernel.
    gates_x = (jnp.einsum("btd,dg->tbg", x_p, w_ih,
                          preferred_element_type=jnp.float32)
               + (b_ih + b_hh)).astype(gates_dtype)                     # (T, B, 4H)

    # VMEM budget: double-buffered gates/out blocks + W_hh + states + headroom.
    g_item = jnp.dtype(gates_dtype).itemsize
    working = (2 * t_blk * b_blk * 4 * hidden * g_item     # gates_x blocks
               + 2 * b_blk * t_blk * hidden * 4            # out blocks
               + 2 * hidden * 4 * hidden * 4               # W_hh buffers
               + 2 * b_blk * hidden * 4                    # h, c scratch
               + 2 * 8 * 128 * 4)                          # lengths tiles
    vmem_limit = max(32 * 1024 * 1024,
                     min(int(1.5 * working) + (2 << 20), 96 * 1024 * 1024))

    cost = pl.CostEstimate(
        flops=2 * t_pad * b_pad * hidden * 4 * hidden + 12 * t_pad * b_pad * hidden,
        transcendentals=5 * t_pad * b_pad * hidden,
        bytes_accessed=(gates_x.size * g_item
                        + b_pad * t_pad * hidden * 4
                        + hidden * 4 * hidden * 4
                        + b_pad * 4),
    )

    out = pl.pallas_call(
        _lstm_recurrence_kernel,
        out_shape=jax.ShapeDtypeStruct((b_pad, t_pad, hidden), jnp.float32),
        grid_spec=pltpu.PrefetchScalarGridSpec(
            num_scalar_prefetch=0,
            grid=(b_pad // b_blk, t_pad // t_blk),
            in_specs=[
                pl.BlockSpec((t_blk, b_blk, 4 * hidden), lambda b, t: (t, b, 0)),
                # Constant time index -> lengths stay VMEM-resident per batch tile.
                pl.BlockSpec((b_blk, 1), lambda b, t: (b, 0)),
                # Constant index_map -> W_hh is DMA'd once and stays VMEM-resident.
                pl.BlockSpec((hidden, 4 * hidden), lambda b, t: (0, 0)),
            ],
            # Batch-first output block: no transpose pass after the kernel.
            out_specs=pl.BlockSpec((b_blk, t_blk, hidden), lambda b, t: (b, t, 0)),
            scratch_shapes=[
                pltpu.VMEM((b_blk, hidden), jnp.float32),   # h state
                pltpu.VMEM((b_blk, hidden), jnp.float32),   # c state
            ],
        ),
        compiler_params=pltpu.CompilerParams(
            # Batch tiles are independent (2nd TC on v7x); time is a true recurrence.
            dimension_semantics=("parallel", "arbitrary"),
            vmem_limit_bytes=vmem_limit,
        ),
        cost_estimate=cost,
    )(gates_x, lengths_p, w_hh)

    return out[:batch, :seq]                                 # already batch-first


def _lstm_reference(x, mask, w_ih, w_hh, b_ih, b_hh):
    """Pure-JAX reference with identical packed-sequence semantics."""
    batch, seq, _ = x.shape
    hidden = w_hh.shape[0]
    h = jnp.zeros((batch, hidden), jnp.float32)
    c = jnp.zeros((batch, hidden), jnp.float32)
    sig = lambda z: 1.0 / (1.0 + jnp.exp(-z))
    outs = []
    for t in range(seq):
        gates = x[:, t] @ w_ih + b_ih + h @ w_hh + b_hh
        i = sig(gates[:, :hidden])
        f = sig(gates[:, hidden:2 * hidden])
        g = jnp.tanh(gates[:, 2 * hidden:3 * hidden])
        o = sig(gates[:, 3 * hidden:])
        c_cand = f * c + i * g
        h_cand = o * jnp.tanh(c_cand)
        m = mask[:, t:t + 1].astype(jnp.float32)
        outs.append(m * h_cand)
        h = m * h_cand + (1.0 - m) * h
        c = m * c_cand + (1.0 - m) * c
    return jnp.stack(outs, axis=1)


if __name__ == "__main__":
    key = jax.random.PRNGKey(0)
    batch, seq, in_dim, hidden = 4, 16, 16, 32   # 4H = 128 -> lane-dense gates

    k_x, k_wi, k_wh, k_bi, k_bh = jax.random.split(key, 5)
    x = jax.random.normal(k_x, (batch, seq, in_dim), jnp.float32)
    w_ih = jax.random.normal(k_wi, (in_dim, 4 * hidden), jnp.float32) * 0.1
    w_hh = jax.random.normal(k_wh, (hidden, 4 * hidden), jnp.float32) * 0.1
    b_ih = jax.random.normal(k_bi, (4 * hidden,), jnp.float32) * 0.1
    b_hh = jax.random.normal(k_bh, (4 * hidden,), jnp.float32) * 0.1

    lengths = jnp.array([seq, 11, 7, 3], dtype=jnp.int32)
    mask = jnp.arange(seq)[None, :] < lengths[:, None]        # (B, T) bool

    out = lstm_seq2seq_forward(x, mask, w_ih, w_hh, b_ih, b_hh, t_blk=8)
    out = jax.block_until_ready(out)

    ref = _lstm_reference(x, mask, w_ih, w_hh, b_ih, b_hh)
    assert out.shape == (batch, seq, hidden), out.shape
    max_err = float(jnp.max(jnp.abs(out - ref)))
    assert jnp.allclose(out, ref, atol=2e-4, rtol=2e-4), f"max_err={max_err}"

    print("KERNEL_OK")
</pallas_src>

<mosaic_0001>
module attributes {stable_mosaic.version = 11 : i64} {
  func.func @_lstm_recurrence_kernel(%arg0: i32, %arg1: i32, %arg2: memref<8x8x128xf32, #tpu.memory_space<vmem>>, %arg3: memref<8x1xi32, #tpu.memory_space<vmem>>, %arg4: memref<32x128xf32, #tpu.memory_space<vmem>>, %arg5: memref<8x8x32xf32, #tpu.memory_space<vmem>>, %arg6: memref<8x32xf32, #tpu.memory_space<vmem>>, %arg7: memref<8x32xf32, #tpu.memory_space<vmem>>) attributes {dimension_semantics = [#tpu.dimension_semantics<parallel>, #tpu.dimension_semantics<arbitrary>], iteration_bounds = array<i64: 1, 2>, scalar_prefetch = 0 : i64, scratch_operands = 2 : i64, tpu.core_type = #tpu.core_type<tc>, window_params = [{transform_indices = @transform_0, window_bounds = array<i64: 8, 8, 128>}, {transform_indices = @transform_1, window_bounds = array<i64: 8, 1>}, {pipeline_mode = #tpu.pipeline_mode<synchronous>, transform_indices = @transform_2, window_bounds = array<i64: 32, 128>}, {transform_indices = @transform_3, window_bounds = array<i64: 8, 8, 32>}]} {
    %c0_i32 = arith.constant 0 : i32
    %0 = arith.cmpi eq, %arg1, %c0_i32 : i32
    %1 = arith.extui %0 : i1 to i32
    %c0_i32_0 = arith.constant 0 : i32
    %2 = arith.cmpi ne, %1, %c0_i32_0 : i32
    scf.if %2 {
      %cst_141 = arith.constant 0.000000e+00 : f32
      %418 = vector.broadcast %cst_141 : f32 to vector<8x32xf32>
      %c0_142 = arith.constant 0 : index
      %c0_143 = arith.constant 0 : index
      %419 = vector.load %arg6[%c0_142, %c0_143] : memref<8x32xf32, #tpu.memory_space<vmem>>, vector<8x32xf32>
      tpu.vector_store %arg6[%c0_142, %c0_143], %418 {strides = array<i32>} : memref<8x32xf32, #tpu.memory_space<vmem>>, vector<8x32xf32>,
      %cst_144 = arith.constant 0.000000e+00 : f32
      %420 = vector.broadcast %cst_144 : f32 to vector<8x32xf32>
      %c0_145 = arith.constant 0 : index
      %c0_146 = arith.constant 0 : index
      %421 = vector.load %arg7[%c0_145, %c0_146] : memref<8x32xf32, #tpu.memory_space<vmem>>, vector<8x32xf32>
      tpu.vector_store %arg7[%c0_145, %c0_146], %420 {strides = array<i32>} : memref<8x32xf32, #tpu.memory_space<vmem>>, vector<8x32xf32>,
    } else {
    }
    %c0 = arith.constant 0 : index
    %c0_1 = arith.constant 0 : index
    %3 = vector.load %arg4[%c0, %c0_1] : memref<32x128xf32, #tpu.memory_space<vmem>>, vector<32x128xf32>
    %c0_2 = arith.constant 0 : index
    %c0_3 = arith.constant 0 : index
    %4 = vector.load %arg3[%c0_2, %c0_3] : memref<8x1xi32, #tpu.memory_space<vmem>>, vector<8x1xi32>
    %c8_i32 = arith.constant 8 : i32
    %5 = arith.muli %arg1, %c8_i32 : i32
    %c0_4 = arith.constant 0 : index
    %c0_5 = arith.constant 0 : index
    %6 = vector.load %arg6[%c0_4, %c0_5] : memref<8x32xf32, #tpu.memory_space<vmem>>, vector<8x32xf32>
    %c0_6 = arith.constant 0 : index
    %c0_7 = arith.constant 0 : index
    %7 = vector.load %arg7[%c0_6, %c0_7] : memref<8x32xf32, #tpu.memory_space<vmem>>, vector<8x32xf32>
    %c0_8 = arith.constant 0 : index
    %c0_9 = arith.constant 0 : index
    %c0_10 = arith.constant 0 : index
    %8 = vector.load %arg2[%c0_8, %c0_9, %c0_10] : memref<8x8x128xf32, #tpu.memory_space<vmem>>, vector<1x8x128xf32>
    %9 = vector.shape_cast %8 : vector<1x8x128xf32> to vector<8x128xf32>
    %cst = arith.constant dense<0.000000e+00> : vector<8x128xf32>
    %10 = tpu.matmul %6, %3, %cst {dimension_numbers = #tpu.dot_dimension_numbers<[1], [0], [0], [1], [0, 0, 1, 1], [], []>} : vector<8x32xf32>, vector<32x128xf32>, vector<8x128xf32> -> vector<8x128xf32>
    %11 = arith.addf %9, %10 : vector<8x128xf32>
    %12 = vector.extract_strided_slice %11 {offsets = [0, 0], sizes = [8, 32], strides = [1, 1]} : vector<8x128xf32> to vector<8x32xf32>
    %cst_11 = arith.constant 5.000000e-01 : f32
    %13 = vector.broadcast %cst_11 : f32 to vector<8x32xf32>
    %14 = arith.mulf %13, %12 : vector<8x32xf32>
    %15 = math.tanh %14 : vector<8x32xf32>
    %cst_12 = arith.constant 5.000000e-01 : f32
    %16 = vector.broadcast %cst_12 : f32 to vector<8x32xf32>
    %17 = arith.mulf %16, %15 : vector<8x32xf32>
    %cst_13 = arith.constant 5.000000e-01 : f32
    %18 = vector.broadcast %cst_13 : f32 to vector<8x32xf32>
    %19 = arith.addf %17, %18 : vector<8x32xf32>
    %20 = vector.extract_strided_slice %11 {offsets = [0, 32], sizes = [8, 32], strides = [1, 1]} : vector<8x128xf32> to vector<8x32xf32>
    %cst_14 = arith.constant 5.000000e-01 : f32
    %21 = vector.broadcast %cst_14 : f32 to vector<8x32xf32>
    %22 = arith.mulf %21, %20 : vector<8x32xf32>
    %23 = math.tanh %22 : vector<8x32xf32>
    %cst_15 = arith.constant 5.000000e-01 : f32
    %24 = vector.broadcast %cst_15 : f32 to vector<8x32xf32>
    %25 = arith.mulf %24, %23 : vector<8x32xf32>
    %cst_16 = arith.constant 5.000000e-01 : f32
    %26 = vector.broadcast %cst_16 : f32 to vector<8x32xf32>
    %27 = arith.addf %25, %26 : vector<8x32xf32>
    %28 = vector.extract_strided_slice %11 {offsets = [0, 64], sizes = [8, 32], strides = [1, 1]} : vector<8x128xf32> to vector<8x32xf32>
    %29 = math.tanh %28 : vector<8x32xf32>
    %30 = vector.extract_strided_slice %11 {offsets = [0, 96], sizes = [8, 32], strides = [1, 1]} : vector<8x128xf32> to vector<8x32xf32>
    %cst_17 = arith.constant 5.000000e-01 : f32
    %31 = vector.broadcast %cst_17 : f32 to vector<8x32xf32>
    %32 = arith.mulf %31, %30 : vector<8x32xf32>
    %33 = math.tanh %32 : vector<8x32xf32>
    %cst_18 = arith.constant 5.000000e-01 : f32
    %34 = vector.broadcast %cst_18 : f32 to vector<8x32xf32>
    %35 = arith.mulf %34, %33 : vector<8x32xf32>
    %cst_19 = arith.constant 5.000000e-01 : f32
    %36 = vector.broadcast %cst_19 : f32 to vector<8x32xf32>
    %37 = arith.addf %35, %36 : vector<8x32xf32>
    %38 = arith.mulf %27, %7 : vector<8x32xf32>
    %39 = arith.mulf %19, %29 : vector<8x32xf32>
    %40 = arith.addf %38, %39 : vector<8x32xf32>
    %41 = math.tanh %40 : vector<8x32xf32>
    %42 = arith.mulf %37, %41 : vector<8x32xf32>
    %c0_i32_20 = arith.constant 0 : i32
    %43 = arith.addi %5, %c0_i32_20 : i32
    %44 = vector.broadcast %43 : i32 to vector<8x1xi32>
    %45 = arith.cmpi sgt, %4, %44 : vector<8x1xi32>
    %cst_21 = arith.constant 0.000000e+00 : f32
    %46 = vector.shape_cast %45 : vector<8x1xi1> to vector<8x1xi1>
    %47 = vector.broadcast %46 : vector<8x1xi1> to vector<8x32xi1>
    %48 = vector.broadcast %cst_21 : f32 to vector<8x32xf32>
    %49 = arith.select %47, %42, %48 : vector<8x32xi1>, vector<8x32xf32>
    %c0_22 = arith.constant 0 : index
    %c0_23 = arith.constant 0 : index
    %c0_24 = arith.constant 0 : index
    %50 = vector.load %arg5[%c0_22, %c0_23, %c0_24] : memref<8x8x32xf32, #tpu.memory_space<vmem>>, vector<8x1x32xf32>
    %51 = vector.shape_cast %50 : vector<8x1x32xf32> to vector<8x32xf32>
    %52 = vector.shape_cast %49 : vector<8x32xf32> to vector<8x1x32xf32>
    tpu.vector_store %arg5[%c0_22, %c0_23, %c0_24], %52 {strides = array<i32>} : memref<8x8x32xf32, #tpu.memory_space<vmem>>, vector<8x1x32xf32>,
    %53 = vector.shape_cast %45 : vector<8x1xi1> to vector<8x1xi1>
    %54 = vector.broadcast %53 : vector<8x1xi1> to vector<8x32xi1>
    %55 = arith.select %54, %42, %6 : vector<8x32xi1>, vector<8x32xf32>
    %56 = vector.shape_cast %45 : vector<8x1xi1> to vector<8x1xi1>
    %57 = vector.broadcast %56 : vector<8x1xi1> to vector<8x32xi1>
    %58 = arith.select %57, %40, %7 : vector<8x32xi1>, vector<8x32xf32>
    %c1 = arith.constant 1 : index
    %c0_25 = arith.constant 0 : index
    %c0_26 = arith.constant 0 : index
    %59 = vector.load %arg2[%c1, %c0_25, %c0_26] : memref<8x8x128xf32, #tpu.memory_space<vmem>>, vector<1x8x128xf32>
    %60 = vector.shape_cast %59 : vector<1x8x128xf32> to vector<8x128xf32>
    %cst_27 = arith.constant dense<0.000000e+00> : vector<8x128xf32>
    %61 = tpu.matmul %55, %3, %cst_27 {dimension_numbers = #tpu.dot_dimension_numbers<[1], [0], [0], [1], [0, 0, 1, 1], [], []>} : vector<8x32xf32>, vector<32x128xf32>, vector<8x128xf32> -> vector<8x128xf32>
    %62 = arith.addf %60, %61 : vector<8x128xf32>
    %63 = vector.extract_strided_slice %62 {offsets = [0, 0], sizes = [8, 32], strides = [1, 1]} : vector<8x128xf32> to vector<8x32xf32>
    %cst_28 = arith.constant 5.000000e-01 : f32
    %64 = vector.broadcast %cst_28 : f32 to vector<8x32xf32>
    %65 = arith.mulf %64, %63 : vector<8x32xf32>
    %66 = math.tanh %65 : vector<8x32xf32>
    %cst_29 = arith.constant 5.000000e-01 : f32
    %67 = vector.broadcast %cst_29 : f32 to vector<8x32xf32>
    %68 = arith.mulf %67, %66 : vector<8x32xf32>
    %cst_30 = arith.constant 5.000000e-01 : f32
    %69 = vector.broadcast %cst_30 : f32 to vector<8x32xf32>
    %70 = arith.addf %68, %69 : vector<8x32xf32>
    %71 = vector.extract_strided_slice %62 {offsets = [0, 32], sizes = [8, 32], strides = [1, 1]} : vector<8x128xf32> to vector<8x32xf32>
    %cst_31 = arith.constant 5.000000e-01 : f32
    %72 = vector.broadcast %cst_31 : f32 to vector<8x32xf32>
    %73 = arith.mulf %72, %71 : vector<8x32xf32>
    %74 = math.tanh %73 : vector<8x32xf32>
    %cst_32 = arith.constant 5.000000e-01 : f32
    %75 = vector.broadcast %cst_32 : f32 to vector<8x32xf32>
    %76 = arith.mulf %75, %74 : vector<8x32xf32>
    %cst_33 = arith.constant 5.000000e-01 : f32
    %77 = vector.broadcast %cst_33 : f32 to vector<8x32xf32>
    %78 = arith.addf %76, %77 : vector<8x32xf32>
    %79 = vector.extract_strided_slice %62 {offsets = [0, 64], sizes = [8, 32], strides = [1, 1]} : vector<8x128xf32> to vector<8x32xf32>
    %80 = math.tanh %79 : vector<8x32xf32>
    %81 = vector.extract_strided_slice %62 {offsets = [0, 96], sizes = [8, 32], strides = [1, 1]} : vector<8x128xf32> to vector<8x32xf32>
    %cst_34 = arith.constant 5.000000e-01 : f32
    %82 = vector.broadcast %cst_34 : f32 to vector<8x32xf32>
    %83 = arith.mulf %82, %81 : vector<8x32xf32>
    %84 = math.tanh %83 : vector<8x32xf32>
    %cst_35 = arith.constant 5.000000e-01 : f32
    %85 = vector.broadcast %cst_35 : f32 to vector<8x32xf32>
    %86 = arith.mulf %85, %84 : vector<8x32xf32>
    %cst_36 = arith.constant 5.000000e-01 : f32
    %87 = vector.broadcast %cst_36 : f32 to vector<8x32xf32>
    %88 = arith.addf %86, %87 : vector<8x32xf32>
    %89 = arith.mulf %78, %58 : vector<8x32xf32>
    %90 = arith.mulf %70, %80 : vector<8x32xf32>
    %91 = arith.addf %89, %90 : vector<8x32xf32>
    %92 = math.tanh %91 : vector<8x32xf32>
    %93 = arith.mulf %88, %92 : vector<8x32xf32>
    %c1_i32 = arith.constant 1 : i32
    %94 = arith.addi %5, %c1_i32 : i32
    %95 = vector.broadcast %94 : i32 to vector<8x1xi32>
    %96 = arith.cmpi sgt, %4, %95 : vector<8x1xi32>
    %cst_37 = arith.constant 0.000000e+00 : f32
    %97 = vector.shape_cast %96 : vector<8x1xi1> to vector<8x1xi1>
    %98 = vector.broadcast %97 : vector<8x1xi1> to vector<8x32xi1>
    %99 = vector.broadcast %cst_37 : f32 to vector<8x32xf32>
    %100 = arith.select %98, %93, %99 : vector<8x32xi1>, vector<8x32xf32>
    %c0_38 = arith.constant 0 : index
    %c1_39 = arith.constant 1 : index
    %c0_40 = arith.constant 0 : index
    %101 = vector.load %arg5[%c0_38, %c1_39, %c0_40] : memref<8x8x32xf32, #tpu.memory_space<vmem>>, vector<8x1x32xf32>
    %102 = vector.shape_cast %101 : vector<8x1x32xf32> to vector<8x32xf32>
    %103 = vector.shape_cast %100 : vector<8x32xf32> to vector<8x1x32xf32>
    tpu.vector_store %arg5[%c0_38, %c1_39, %c0_40], %103 {strides = array<i32>} : memref<8x8x32xf32, #tpu.memory_space<vmem>>, vector<8x1x32xf32>,
    %104 = vector.shape_cast %96 : vector<8x1xi1> to vector<8x1xi1>
    %105 = vector.broadcast %104 : vector<8x1xi1> to vector<8x32xi1>
    %106 = arith.select %105, %93, %55 : vector<8x32xi1>, vector<8x32xf32>
    %107 = vector.shape_cast %96 : vector<8x1xi1> to vector<8x1xi1>
    %108 = vector.broadcast %107 : vector<8x1xi1> to vector<8x32xi1>
    %109 = arith.select %108, %91, %58 : vector<8x32xi1>, vector<8x32xf32>
    %c2 = arith.constant 2 : index
    %c0_41 = arith.constant 0 : index
    %c0_42 = arith.constant 0 : index
    %110 = vector.load %arg2[%c2, %c0_41, %c0_42] : memref<8x8x128xf32, #tpu.memory_space<vmem>>, vector<1x8x128xf32>
    %111 = vector.shape_cast %110 : vector<1x8x128xf32> to vector<8x128xf32>
    %cst_43 = arith.constant dense<0.000000e+00> : vector<8x128xf32>
    %112 = tpu.matmul %106, %3, %cst_43 {dimension_numbers = #tpu.dot_dimension_numbers<[1], [0], [0], [1], [0, 0, 1, 1], [], []>} : vector<8x32xf32>, vector<32x128xf32>, vector<8x128xf32> -> vector<8x128xf32>
    %113 = arith.addf %111, %112 : vector<8x128xf32>
    %114 = vector.extract_strided_slice %113 {offsets = [0, 0], sizes = [8, 32], strides = [1, 1]} : vector<8x128xf32> to vector<8x32xf32>
    %cst_44 = arith.constant 5.000000e-01 : f32
    %115 = vector.broadcast %cst_44 : f32 to vector<8x32xf32>
    %116 = arith.mulf %115, %114 : vector<8x32xf32>
    %117 = math.tanh %116 : vector<8x32xf32>
    %cst_45 = arith.constant 5.000000e-01 : f32
    %118 = vector.broadcast %cst_45 : f32 to vector<8x32xf32>
    %119 = arith.mulf %118, %117 : vector<8x32xf32>
    %cst_46 = arith.constant 5.000000e-01 : f32
    %120 = vector.broadcast %cst_46 : f32 to vector<8x32xf32>
    %121 = arith.addf %119, %120 : vector<8x32xf32>
    %122 = vector.extract_strided_slice %113 {offsets = [0, 32], sizes = [8, 32], strides = [1, 1]} : vector<8x128xf32> to vector<8x32xf32>
    %cst_47 = arith.constant 5.000000e-01 : f32
    %123 = vector.broadcast %cst_47 : f32 to vector<8x32xf32>
    %124 = arith.mulf %123, %122 : vector<8x32xf32>
    %125 = math.tanh %124 : vector<8x32xf32>
    %cst_48 = arith.constant 5.000000e-01 : f32
    %126 = vector.broadcast %cst_48 : f32 to vector<8x32xf32>
    %127 = arith.mulf %126, %125 : vector<8x32xf32>
    %cst_49 = arith.constant 5.000000e-01 : f32
    %128 = vector.broadcast %cst_49 : f32 to vector<8x32xf32>
    %129 = arith.addf %127, %128 : vector<8x32xf32>
    %130 = vector.extract_strided_slice %113 {offsets = [0, 64], sizes = [8, 32], strides = [1, 1]} : vector<8x128xf32> to vector<8x32xf32>
    %131 = math.tanh %130 : vector<8x32xf32>
    %132 = vector.extract_strided_slice %113 {offsets = [0, 96], sizes = [8, 32], strides = [1, 1]} : vector<8x128xf32> to vector<8x32xf32>
    %cst_50 = arith.constant 5.000000e-01 : f32
    %133 = vector.broadcast %cst_50 : f32 to vector<8x32xf32>
    %134 = arith.mulf %133, %132 : vector<8x32xf32>
    %135 = math.tanh %134 : vector<8x32xf32>
    %cst_51 = arith.constant 5.000000e-01 : f32
    %136 = vector.broadcast %cst_51 : f32 to vector<8x32xf32>
    %137 = arith.mulf %136, %135 : vector<8x32xf32>
    %cst_52 = arith.constant 5.000000e-01 : f32
    %138 = vector.broadcast %cst_52 : f32 to vector<8x32xf32>
    %139 = arith.addf %137, %138 : vector<8x32xf32>
    %140 = arith.mulf %129, %109 : vector<8x32xf32>
    %141 = arith.mulf %121, %131 : vector<8x32xf32>
    %142 = arith.addf %140, %141 : vector<8x32xf32>
    %143 = math.tanh %142 : vector<8x32xf32>
    %144 = arith.mulf %139, %143 : vector<8x32xf32>
    %c2_i32 = arith.constant 2 : i32
    %145 = arith.addi %5, %c2_i32 : i32
    %146 = vector.broadcast %145 : i32 to vector<8x1xi32>
    %147 = arith.cmpi sgt, %4, %146 : vector<8x1xi32>
    %cst_53 = arith.constant 0.000000e+00 : f32
    %148 = vector.shape_cast %147 : vector<8x1xi1> to vector<8x1xi1>
    %149 = vector.broadcast %148 : vector<8x1xi1> to vector<8x32xi1>
    %150 = vector.broadcast %cst_53 : f32 to vector<8x32xf32>
    %151 = arith.select %149, %144, %150 : vector<8x32xi1>, vector<8x32xf32>
    %c0_54 = arith.constant 0 : index
    %c2_55 = arith.constant 2 : index
    %c0_56 = arith.constant 0 : index
    %152 = vector.load %arg5[%c0_54, %c2_55, %c0_56] : memref<8x8x32xf32, #tpu.memory_space<vmem>>, vector<8x1x32xf32>
    %153 = vector.shape_cast %152 : vector<8x1x32xf32> to vector<8x32xf32>
    %154 = vector.shape_cast %151 : vector<8x32xf32> to vector<8x1x32xf32>
    tpu.vector_store %arg5[%c0_54, %c2_55, %c0_56], %154 {strides = array<i32>} : memref<8x8x32xf32, #tpu.memory_space<vmem>>, vector<8x1x32xf32>,
    %155 = vector.shape_cast %147 : vector<8x1xi1> to vector<8x1xi1>
    %156 = vector.broadcast %155 : vector<8x1xi1> to vector<8x32xi1>
    %157 = arith.select %156, %144, %106 : vector<8x32xi1>, vector<8x32xf32>
    %158 = vector.shape_cast %147 : vector<8x1xi1> to vector<8x1xi1>
    %159 = vector.broadcast %158 : vector<8x1xi1> to vector<8x32xi1>
    %160 = arith.select %159, %142, %109 : vector<8x32xi1>, vector<8x32xf32>
    %c3 = arith.constant 3 : index
    %c0_57 = arith.constant 0 : index
    %c0_58 = arith.constant 0 : index
    %161 = vector.load %arg2[%c3, %c0_57, %c0_58] : memref<8x8x128xf32, #tpu.memory_space<vmem>>, vector<1x8x128xf32>
    %162 = vector.shape_cast %161 : vector<1x8x128xf32> to vector<8x128xf32>
    %cst_59 = arith.constant dense<0.000000e+00> : vector<8x128xf32>
    %163 = tpu.matmul %157, %3, %cst_59 {dimension_numbers = #tpu.dot_dimension_numbers<[1], [0], [0], [1], [0, 0, 1, 1], [], []>} : vector<8x32xf32>, vector<32x128xf32>, vector<8x128xf32> -> vector<8x128xf32>
    %164 = arith.addf %162, %163 : vector<8x128xf32>
    %165 = vector.extract_strided_slice %164 {offsets = [0, 0], sizes = [8, 32], strides = [1, 1]} : vector<8x128xf32> to vector<8x32xf32>
    %cst_60 = arith.constant 5.000000e-01 : f32
    %166 = vector.broadcast %cst_60 : f32 to vector<8x32xf32>
    %167 = arith.mulf %166, %165 : vector<8x32xf32>
    %168 = math.tanh %167 : vector<8x32xf32>
    %cst_61 = arith.constant 5.000000e-01 : f32
    %169 = vector.broadcast %cst_61 : f32 to vector<8x32xf32>
    %170 = arith.mulf %169, %168 : vector<8x32xf32>
    %cst_62 = arith.constant 5.000000e-01 : f32
    %171 = vector.broadcast %cst_62 : f32 to vector<8x32xf32>
    %172 = arith.addf %170, %171 : vector<8x32xf32>
    %173 = vector.extract_strided_slice %164 {offsets = [0, 32], sizes = [8, 32], strides = [1, 1]} : vector<8x128xf32> to vector<8x32xf32>
    %cst_63 = arith.constant 5.000000e-01 : f32
    %174 = vector.broadcast %cst_63 : f32 to vector<8x32xf32>
    %175 = arith.mulf %174, %173 : vector<8x32xf32>
    %176 = math.tanh %175 : vector<8x32xf32>
    %cst_64 = arith.constant 5.000000e-01 : f32
    %177 = vector.broadcast %cst_64 : f32 to vector<8x32xf32>
    %178 = arith.mulf %177, %176 : vector<8x32xf32>
    %cst_65 = arith.constant 5.000000e-01 : f32
    %179 = vector.broadcast %cst_65 : f32 to vector<8x32xf32>
    %180 = arith.addf %178, %179 : vector<8x32xf32>
    %181 = vector.extract_strided_slice %164 {offsets = [0, 64], sizes = [8, 32], strides = [1, 1]} : vector<8x128xf32> to vector<8x32xf32>
    %182 = math.tanh %181 : vector<8x32xf32>
    %183 = vector.extract_strided_slice %164 {offsets = [0, 96], sizes = [8, 32], strides = [1, 1]} : vector<8x128xf32> to vector<8x32xf32>
    %cst_66 = arith.constant 5.000000e-01 : f32
    %184 = vector.broadcast %cst_66 : f32 to vector<8x32xf32>
    %185 = arith.mulf %184, %183 : vector<8x32xf32>
    %186 = math.tanh %185 : vector<8x32xf32>
    %cst_67 = arith.constant 5.000000e-01 : f32
    %187 = vector.broadcast %cst_67 : f32 to vector<8x32xf32>
    %188 = arith.mulf %187, %186 : vector<8x32xf32>
    %cst_68 = arith.constant 5.000000e-01 : f32
    %189 = vector.broadcast %cst_68 : f32 to vector<8x32xf32>
    %190 = arith.addf %188, %189 : vector<8x32xf32>
    %191 = arith.mulf %180, %160 : vector<8x32xf32>
    %192 = arith.mulf %172, %182 : vector<8x32xf32>
    %193 = arith.addf %191, %192 : vector<8x32xf32>
    %194 = math.tanh %193 : vector<8x32xf32>
    %195 = arith.mulf %190, %194 : vector<8x32xf32>
    %c3_i32 = arith.constant 3 : i32
    %196 = arith.addi %5, %c3_i32 : i32
    %197 = vector.broadcast %196 : i32 to vector<8x1xi32>
    %198 = arith.cmpi sgt, %4, %197 : vector<8x1xi32>
    %cst_69 = arith.constant 0.000000e+00 : f32
    %199 = vector.shape_cast %198 : vector<8x1xi1> to vector<8x1xi1>
    %200 = vector.broadcast %199 : vector<8x1xi1> to vector<8x32xi1>
    %201 = vector.broadcast %cst_69 : f32 to vector<8x32xf32>
    %202 = arith.select %200, %195, %201 : vector<8x32xi1>, vector<8x32xf32>
    %c0_70 = arith.constant 0 : index
    %c3_71 = arith.constant 3 : index
    %c0_72 = arith.constant 0 : index
    %203 = vector.load %arg5[%c0_70, %c3_71, %c0_72] : memref<8x8x32xf32, #tpu.memory_space<vmem>>, vector<8x1x32xf32>
    %204 = vector.shape_cast %203 : vector<8x1x32xf32> to vector<8x32xf32>
    %205 = vector.shape_cast %202 : vector<8x32xf32> to vector<8x1x32xf32>
    tpu.vector_store %arg5[%c0_70, %c3_71, %c0_72], %205 {strides = array<i32>} : memref<8x8x32xf32, #tpu.memory_space<vmem>>, vector<8x1x32xf32>,
    %206 = vector.shape_cast %198 : vector<8x1xi1> to vector<8x1xi1>
    %207 = vector.broadcast %206 : vector<8x1xi1> to vector<8x32xi1>
    %208 = arith.select %207, %195, %157 : vector<8x32xi1>, vector<8x32xf32>
    %209 = vector.shape_cast %198 : vector<8x1xi1> to vector<8x1xi1>
    %210 = vector.broadcast %209 : vector<8x1xi1> to vector<8x32xi1>
    %211 = arith.select %210, %193, %160 : vector<8x32xi1>, vector<8x32xf32>
    %c4 = arith.constant 4 : index
    %c0_73 = arith.constant 0 : index
    %c0_74 = arith.constant 0 : index
    %212 = vector.load %arg2[%c4, %c0_73, %c0_74] : memref<8x8x128xf32, #tpu.memory_space<vmem>>, vector<1x8x128xf32>
    %213 = vector.shape_cast %212 : vector<1x8x128xf32> to vector<8x128xf32>
    %cst_75 = arith.constant dense<0.000000e+00> : vector<8x128xf32>
    %214 = tpu.matmul %208, %3, %cst_75 {dimension_numbers = #tpu.dot_dimension_numbers<[1], [0], [0], [1], [0, 0, 1, 1], [], []>} : vector<8x32xf32>, vector<32x128xf32>, vector<8x128xf32> -> vector<8x128xf32>
    %215 = arith.addf %213, %214 : vector<8x128xf32>
    %216 = vector.extract_strided_slice %215 {offsets = [0, 0], sizes = [8, 32], strides = [1, 1]} : vector<8x128xf32> to vector<8x32xf32>
    %cst_76 = arith.constant 5.000000e-01 : f32
    %217 = vector.broadcast %cst_76 : f32 to vector<8x32xf32>
    %218 = arith.mulf %217, %216 : vector<8x32xf32>
    %219 = math.tanh %218 : vector<8x32xf32>
    %cst_77 = arith.constant 5.000000e-01 : f32
    %220 = vector.broadcast %cst_77 : f32 to vector<8x32xf32>
    %221 = arith.mulf %220, %219 : vector<8x32xf32>
    %cst_78 = arith.constant 5.000000e-01 : f32
    %222 = vector.broadcast %cst_78 : f32 to vector<8x32xf32>
    %223 = arith.addf %221, %222 : vector<8x32xf32>
    %224 = vector.extract_strided_slice %215 {offsets = [0, 32], sizes = [8, 32], strides = [1, 1]} : vector<8x128xf32> to vector<8x32xf32>
    %cst_79 = arith.constant 5.000000e-01 : f32
    %225 = vector.broadcast %cst_79 : f32 to vector<8x32xf32>
    %226 = arith.mulf %225, %224 : vector<8x32xf32>
    %227 = math.tanh %226 : vector<8x32xf32>
    %cst_80 = arith.constant 5.000000e-01 : f32
    %228 = vector.broadcast %cst_80 : f32 to vector<8x32xf32>
    %229 = arith.mulf %228, %227 : vector<8x32xf32>
    %cst_81 = arith.constant 5.000000e-01 : f32
    %230 = vector.broadcast %cst_81 : f32 to vector<8x32xf32>
    %231 = arith.addf %229, %230 : vector<8x32xf32>
    %232 = vector.extract_strided_slice %215 {offsets = [0, 64], sizes = [8, 32], strides = [1, 1]} : vector<8x128xf32> to vector<8x32xf32>
    %233 = math.tanh %232 : vector<8x32xf32>
    %234 = vector.extract_strided_slice %215 {offsets = [0, 96], sizes = [8, 32], strides = [1, 1]} : vector<8x128xf32> to vector<8x32xf32>
    %cst_82 = arith.constant 5.000000e-01 : f32
    %235 = vector.broadcast %cst_82 : f32 to vector<8x32xf32>
    %236 = arith.mulf %235, %234 : vector<8x32xf32>
    %237 = math.tanh %236 : vector<8x32xf32>
    %cst_83 = arith.constant 5.000000e-01 : f32
    %238 = vector.broadcast %cst_83 : f32 to vector<8x32xf32>
    %239 = arith.mulf %238, %237 : vector<8x32xf32>
    %cst_84 = arith.constant 5.000000e-01 : f32
    %240 = vector.broadcast %cst_84 : f32 to vector<8x32xf32>
    %241 = arith.addf %239, %240 : vector<8x32xf32>
    %242 = arith.mulf %231, %211 : vector<8x32xf32>
    %243 = arith.mulf %223, %233 : vector<8x32xf32>
    %244 = arith.addf %242, %243 : vector<8x32xf32>
    %245 = math.tanh %244 : vector<8x32xf32>
    %246 = arith.mulf %241, %245 : vector<8x32xf32>
    %c4_i32 = arith.constant 4 : i32
    %247 = arith.addi %5, %c4_i32 : i32
    %248 = vector.broadcast %247 : i32 to vector<8x1xi32>
    %249 = arith.cmpi sgt, %4, %248 : vector<8x1xi32>
    %cst_85 = arith.constant 0.000000e+00 : f32
    %250 = vector.shape_cast %249 : vector<8x1xi1> to vector<8x1xi1>
    %251 = vector.broadcast %250 : vector<8x1xi1> to vector<8x32xi1>
    %252 = vector.broadcast %cst_85 : f32 to vector<8x32xf32>
    %253 = arith.select %251, %246, %252 : vector<8x32xi1>, vector<8x32xf32>
    %c0_86 = arith.constant 0 : index
    %c4_87 = arith.constant 4 : index
    %c0_88 = arith.constant 0 : index
    %254 = vector.load %arg5[%c0_86, %c4_87, %c0_88] : memref<8x8x32xf32, #tpu.memory_space<vmem>>, vector<8x1x32xf32>
    %255 = vector.shape_cast %254 : vector<8x1x32xf32> to vector<8x32xf32>
    %256 = vector.shape_cast %253 : vector<8x32xf32> to vector<8x1x32xf32>
    tpu.vector_store %arg5[%c0_86, %c4_87, %c0_88], %256 {strides = array<i32>} : memref<8x8x32xf32, #tpu.memory_space<vmem>>, vector<8x1x32xf32>,
    %257 = vector.shape_cast %249 : vector<8x1xi1> to vector<8x1xi1>
    %258 = vector.broadcast %257 : vector<8x1xi1> to vector<8x32xi1>
    %259 = arith.select %258, %246, %208 : vector<8x32xi1>, vector<8x32xf32>
    %260 = vector.shape_cast %249 : vector<8x1xi1> to vector<8x1xi1>
    %261 = vector.broadcast %260 : vector<8x1xi1> to vector<8x32xi1>
    %262 = arith.select %261, %244, %211 : vector<8x32xi1>, vector<8x32xf32>
    %c5 = arith.constant 5 : index
    %c0_89 = arith.constant 0 : index
    %c0_90 = arith.constant 0 : index
    %263 = vector.load %arg2[%c5, %c0_89, %c0_90] : memref<8x8x128xf32, #tpu.memory_space<vmem>>, vector<1x8x128xf32>
    %264 = vector.shape_cast %263 : vector<1x8x128xf32> to vector<8x128xf32>
    %cst_91 = arith.constant dense<0.000000e+00> : vector<8x128xf32>
    %265 = tpu.matmul %259, %3, %cst_91 {dimension_numbers = #tpu.dot_dimension_numbers<[1], [0], [0], [1], [0, 0, 1, 1], [], []>} : vector<8x32xf32>, vector<32x128xf32>, vector<8x128xf32> -> vector<8x128xf32>
    %266 = arith.addf %264, %265 : vector<8x128xf32>
    %267 = vector.extract_strided_slice %266 {offsets = [0, 0], sizes = [8, 32], strides = [1, 1]} : vector<8x128xf32> to vector<8x32xf32>
    %cst_92 = arith.constant 5.000000e-01 : f32
    %268 = vector.broadcast %cst_92 : f32 to vector<8x32xf32>
    %269 = arith.mulf %268, %267 : vector<8x32xf32>
    %270 = math.tanh %269 : vector<8x32xf32>
    %cst_93 = arith.constant 5.000000e-01 : f32
    %271 = vector.broadcast %cst_93 : f32 to vector<8x32xf32>
    %272 = arith.mulf %271, %270 : vector<8x32xf32>
    %cst_94 = arith.constant 5.000000e-01 : f32
    %273 = vector.broadcast %cst_94 : f32 to vector<8x32xf32>
    %274 = arith.addf %272, %273 : vector<8x32xf32>
    %275 = vector.extract_strided_slice %266 {offsets = [0, 32], sizes = [8, 32], strides = [1, 1]} : vector<8x128xf32> to vector<8x32xf32>
    %cst_95 = arith.constant 5.000000e-01 : f32
    %276 = vector.broadcast %cst_95 : f32 to vector<8x32xf32>
    %277 = arith.mulf %276, %275 : vector<8x32xf32>
    %278 = math.tanh %277 : vector<8x32xf32>
    %cst_96 = arith.constant 5.000000e-01 : f32
    %279 = vector.broadcast %cst_96 : f32 to vector<8x32xf32>
    %280 = arith.mulf %279, %278 : vector<8x32xf32>
    %cst_97 = arith.constant 5.000000e-01 : f32
    %281 = vector.broadcast %cst_97 : f32 to vector<8x32xf32>
    %282 = arith.addf %280, %281 : vector<8x32xf32>
    %283 = vector.extract_strided_slice %266 {offsets = [0, 64], sizes = [8, 32], strides = [1, 1]} : vector<8x128xf32> to vector<8x32xf32>
    %284 = math.tanh %283 : vector<8x32xf32>
    %285 = vector.extract_strided_slice %266 {offsets = [0, 96], sizes = [8, 32], strides = [1, 1]} : vector<8x128xf32> to vector<8x32xf32>
    %cst_98 = arith.constant 5.000000e-01 : f32
    %286 = vector.broadcast %cst_98 : f32 to vector<8x32xf32>
    %287 = arith.mulf %286, %285 : vector<8x32xf32>
    %288 = math.tanh %287 : vector<8x32xf32>
    %cst_99 = arith.constant 5.000000e-01 : f32
    %289 = vector.broadcast %cst_99 : f32 to vector<8x32xf32>
    %290 = arith.mulf %289, %288 : vector<8x32xf32>
    %cst_100 = arith.constant 5.000000e-01 : f32
    %291 = vector.broadcast %cst_100 : f32 to vector<8x32xf32>
    %292 = arith.addf %290, %291 : vector<8x32xf32>
    %293 = arith.mulf %282, %262 : vector<8x32xf32>
    %294 = arith.mulf %274, %284 : vector<8x32xf32>
    %295 = arith.addf %293, %294 : vector<8x32xf32>
    %296 = math.tanh %295 : vector<8x32xf32>
    %297 = arith.mulf %292, %296 : vector<8x32xf32>
    %c5_i32 = arith.constant 5 : i32
    %298 = arith.addi %5, %c5_i32 : i32
    %299 = vector.broadcast %298 : i32 to vector<8x1xi32>
    %300 = arith.cmpi sgt, %4, %299 : vector<8x1xi32>
    %cst_101 = arith.constant 0.000000e+00 : f32
    %301 = vector.shape_cast %300 : vector<8x1xi1> to vector<8x1xi1>
    %302 = vector.broadcast %301 : vector<8x1xi1> to vector<8x32xi1>
    %303 = vector.broadcast %cst_101 : f32 to vector<8x32xf32>
    %304 = arith.select %302, %297, %303 : vector<8x32xi1>, vector<8x32xf32>
    %c0_102 = arith.constant 0 : index
    %c5_103 = arith.constant 5 : index
    %c0_104 = arith.constant 0 : index
    %305 = vector.load %arg5[%c0_102, %c5_103, %c0_104] : memref<8x8x32xf32, #tpu.memory_space<vmem>>, vector<8x1x32xf32>
    %306 = vector.shape_cast %305 : vector<8x1x32xf32> to vector<8x32xf32>
    %307 = vector.shape_cast %304 : vector<8x32xf32> to vector<8x1x32xf32>
    tpu.vector_store %arg5[%c0_102, %c5_103, %c0_104], %307 {strides = array<i32>} : memref<8x8x32xf32, #tpu.memory_space<vmem>>, vector<8x1x32xf32>,
    %308 = vector.shape_cast %300 : vector<8x1xi1> to vector<8x1xi1>
    %309 = vector.broadcast %308 : vector<8x1xi1> to vector<8x32xi1>
    %310 = arith.select %309, %297, %259 : vector<8x32xi1>, vector<8x32xf32>
    %311 = vector.shape_cast %300 : vector<8x1xi1> to vector<8x1xi1>
    %312 = vector.broadcast %311 : vector<8x1xi1> to vector<8x32xi1>
    %313 = arith.select %312, %295, %262 : vector<8x32xi1>, vector<8x32xf32>
    %c6 = arith.constant 6 : index
    %c0_105 = arith.constant 0 : index
    %c0_106 = arith.constant 0 : index
    %314 = vector.load %arg2[%c6, %c0_105, %c0_106] : memref<8x8x128xf32, #tpu.memory_space<vmem>>, vector<1x8x128xf32>
    %315 = vector.shape_cast %314 : vector<1x8x128xf32> to vector<8x128xf32>
    %cst_107 = arith.constant dense<0.000000e+00> : vector<8x128xf32>
    %316 = tpu.matmul %310, %3, %cst_107 {dimension_numbers = #tpu.dot_dimension_numbers<[1], [0], [0], [1], [0, 0, 1, 1], [], []>} : vector<8x32xf32>, vector<32x128xf32>, vector<8x128xf32> -> vector<8x128xf32>
    %317 = arith.addf %315, %316 : vector<8x128xf32>
    %318 = vector.extract_strided_slice %317 {offsets = [0, 0], sizes = [8, 32], strides = [1, 1]} : vector<8x128xf32> to vector<8x32xf32>
    %cst_108 = arith.constant 5.000000e-01 : f32
    %319 = vector.broadcast %cst_108 : f32 to vector<8x32xf32>
    %320 = arith.mulf %319, %318 : vector<8x32xf32>
    %321 = math.tanh %320 : vector<8x32xf32>
    %cst_109 = arith.constant 5.000000e-01 : f32
    %322 = vector.broadcast %cst_109 : f32 to vector<8x32xf32>
    %323 = arith.mulf %322, %321 : vector<8x32xf32>
    %cst_110 = arith.constant 5.000000e-01 : f32
    %324 = vector.broadcast %cst_110 : f32 to vector<8x32xf32>
    %325 = arith.addf %323, %324 : vector<8x32xf32>
    %326 = vector.extract_strided_slice %317 {offsets = [0, 32], sizes = [8, 32], strides = [1, 1]} : vector<8x128xf32> to vector<8x32xf32>
    %cst_111 = arith.constant 5.000000e-01 : f32
    %327 = vector.broadcast %cst_111 : f32 to vector<8x32xf32>
    %328 = arith.mulf %327, %326 : vector<8x32xf32>
    %329 = math.tanh %328 : vector<8x32xf32>
    %cst_112 = arith.constant 5.000000e-01 : f32
    %330 = vector.broadcast %cst_112 : f32 to vector<8x32xf32>
    %331 = arith.mulf %330, %329 : vector<8x32xf32>
    %cst_113 = arith.constant 5.000000e-01 : f32
    %332 = vector.broadcast %cst_113 : f32 to vector<8x32xf32>
    %333 = arith.addf %331, %332 : vector<8x32xf32>
    %334 = vector.extract_strided_slice %317 {offsets = [0, 64], sizes = [8, 32], strides = [1, 1]} : vector<8x128xf32> to vector<8x32xf32>
    %335 = math.tanh %334 : vector<8x32xf32>
    %336 = vector.extract_strided_slice %317 {offsets = [0, 96], sizes = [8, 32], strides = [1, 1]} : vector<8x128xf32> to vector<8x32xf32>
    %cst_114 = arith.constant 5.000000e-01 : f32
    %337 = vector.broadcast %cst_114 : f32 to vector<8x32xf32>
    %338 = arith.mulf %337, %336 : vector<8x32xf32>
    %339 = math.tanh %338 : vector<8x32xf32>
    %cst_115 = arith.constant 5.000000e-01 : f32
    %340 = vector.broadcast %cst_115 : f32 to vector<8x32xf32>
    %341 = arith.mulf %340, %339 : vector<8x32xf32>
    %cst_116 = arith.constant 5.000000e-01 : f32
    %342 = vector.broadcast %cst_116 : f32 to vector<8x32xf32>
    %343 = arith.addf %341, %342 : vector<8x32xf32>
    %344 = arith.mulf %333, %313 : vector<8x32xf32>
    %345 = arith.mulf %325, %335 : vector<8x32xf32>
    %346 = arith.addf %344, %345 : vector<8x32xf32>
    %347 = math.tanh %346 : vector<8x32xf32>
    %348 = arith.mulf %343, %347 : vector<8x32xf32>
    %c6_i32 = arith.constant 6 : i32
    %349 = arith.addi %5, %c6_i32 : i32
    %350 = vector.broadcast %349 : i32 to vector<8x1xi32>
    %351 = arith.cmpi sgt, %4, %350 : vector<8x1xi32>
    %cst_117 = arith.constant 0.000000e+00 : f32
    %352 = vector.shape_cast %351 : vector<8x1xi1> to vector<8x1xi1>
    %353 = vector.broadcast %352 : vector<8x1xi1> to vector<8x32xi1>
    %354 = vector.broadcast %cst_117 : f32 to vector<8x32xf32>
    %355 = arith.select %353, %348, %354 : vector<8x32xi1>, vector<8x32xf32>
    %c0_118 = arith.constant 0 : index
    %c6_119 = arith.constant 6 : index
    %c0_120 = arith.constant 0 : index
    %356 = vector.load %arg5[%c0_118, %c6_119, %c0_120] : memref<8x8x32xf32, #tpu.memory_space<vmem>>, vector<8x1x32xf32>
    %357 = vector.shape_cast %356 : vector<8x1x32xf32> to vector<8x32xf32>
    %358 = vector.shape_cast %355 : vector<8x32xf32> to vector<8x1x32xf32>
    tpu.vector_store %arg5[%c0_118, %c6_119, %c0_120], %358 {strides = array<i32>} : memref<8x8x32xf32, #tpu.memory_space<vmem>>, vector<8x1x32xf32>,
    %359 = vector.shape_cast %351 : vector<8x1xi1> to vector<8x1xi1>
    %360 = vector.broadcast %359 : vector<8x1xi1> to vector<8x32xi1>
    %361 = arith.select %360, %348, %310 : vector<8x32xi1>, vector<8x32xf32>
    %362 = vector.shape_cast %351 : vector<8x1xi1> to vector<8x1xi1>
    %363 = vector.broadcast %362 : vector<8x1xi1> to vector<8x32xi1>
    %364 = arith.select %363, %346, %313 : vector<8x32xi1>, vector<8x32xf32>
    %c7 = arith.constant 7 : index
    %c0_121 = arith.constant 0 : index
    %c0_122 = arith.constant 0 : index
    %365 = vector.load %arg2[%c7, %c0_121, %c0_122] : memref<8x8x128xf32, #tpu.memory_space<vmem>>, vector<1x8x128xf32>
    %366 = vector.shape_cast %365 : vector<1x8x128xf32> to vector<8x128xf32>
    %cst_123 = arith.constant dense<0.000000e+00> : vector<8x128xf32>
    %367 = tpu.matmul %361, %3, %cst_123 {dimension_numbers = #tpu.dot_dimension_numbers<[1], [0], [0], [1], [0, 0, 1, 1], [], []>} : vector<8x32xf32>, vector<32x128xf32>, vector<8x128xf32> -> vector<8x128xf32>
    %368 = arith.addf %366, %367 : vector<8x128xf32>
    %369 = vector.extract_strided_slice %368 {offsets = [0, 0], sizes = [8, 32], strides = [1, 1]} : vector<8x128xf32> to vector<8x32xf32>
    %cst_124 = arith.constant 5.000000e-01 : f32
    %370 = vector.broadcast %cst_124 : f32 to vector<8x32xf32>
    %371 = arith.mulf %370, %369 : vector<8x32xf32>
    %372 = math.tanh %371 : vector<8x32xf32>
    %cst_125 = arith.constant 5.000000e-01 : f32
    %373 = vector.broadcast %cst_125 : f32 to vector<8x32xf32>
    %374 = arith.mulf %373, %372 : vector<8x32xf32>
    %cst_126 = arith.constant 5.000000e-01 : f32
    %375 = vector.broadcast %cst_126 : f32 to vector<8x32xf32>
    %376 = arith.addf %374, %375 : vector<8x32xf32>
    %377 = vector.extract_strided_slice %368 {offsets = [0, 32], sizes = [8, 32], strides = [1, 1]} : vector<8x128xf32> to vector<8x32xf32>
    %cst_127 = arith.constant 5.000000e-01 : f32
    %378 = vector.broadcast %cst_127 : f32 to vector<8x32xf32>
    %379 = arith.mulf %378, %377 : vector<8x32xf32>
    %380 = math.tanh %379 : vector<8x32xf32>
    %cst_128 = arith.constant 5.000000e-01 : f32
    %381 = vector.broadcast %cst_128 : f32 to vector<8x32xf32>
    %382 = arith.mulf %381, %380 : vector<8x32xf32>
    %cst_129 = arith.constant 5.000000e-01 : f32
    %383 = vector.broadcast %cst_129 : f32 to vector<8x32xf32>
    %384 = arith.addf %382, %383 : vector<8x32xf32>
    %385 = vector.extract_strided_slice %368 {offsets = [0, 64], sizes = [8, 32], strides = [1, 1]} : vector<8x128xf32> to vector<8x32xf32>
    %386 = math.tanh %385 : vector<8x32xf32>
    %387 = vector.extract_strided_slice %368 {offsets = [0, 96], sizes = [8, 32], strides = [1, 1]} : vector<8x128xf32> to vector<8x32xf32>
    %cst_130 = arith.constant 5.000000e-01 : f32
    %388 = vector.broadcast %cst_130 : f32 to vector<8x32xf32>
    %389 = arith.mulf %388, %387 : vector<8x32xf32>
    %390 = math.tanh %389 : vector<8x32xf32>
    %cst_131 = arith.constant 5.000000e-01 : f32
    %391 = vector.broadcast %cst_131 : f32 to vector<8x32xf32>
    %392 = arith.mulf %391, %390 : vector<8x32xf32>
    %cst_132 = arith.constant 5.000000e-01 : f32
    %393 = vector.broadcast %cst_132 : f32 to vector<8x32xf32>
    %394 = arith.addf %392, %393 : vector<8x32xf32>
    %395 = arith.mulf %384, %364 : vector<8x32xf32>
    %396 = arith.mulf %376, %386 : vector<8x32xf32>
    %397 = arith.addf %395, %396 : vector<8x32xf32>
    %398 = math.tanh %397 : vector<8x32xf32>
    %399 = arith.mulf %394, %398 : vector<8x32xf32>
    %c7_i32 = arith.constant 7 : i32
    %400 = arith.addi %5, %c7_i32 : i32
    %401 = vector.broadcast %400 : i32 to vector<8x1xi32>
    %402 = arith.cmpi sgt, %4, %401 : vector<8x1xi32>
    %cst_133 = arith.constant 0.000000e+00 : f32
    %403 = vector.shape_cast %402 : vector<8x1xi1> to vector<8x1xi1>
    %404 = vector.broadcast %403 : vector<8x1xi1> to vector<8x32xi1>
    %405 = vector.broadcast %cst_133 : f32 to vector<8x32xf32>
    %406 = arith.select %404, %399, %405 : vector<8x32xi1>, vector<8x32xf32>
    %c0_134 = arith.constant 0 : index
    %c7_135 = arith.constant 7 : index
    %c0_136 = arith.constant 0 : index
    %407 = vector.load %arg5[%c0_134, %c7_135, %c0_136] : memref<8x8x32xf32, #tpu.memory_space<vmem>>, vector<8x1x32xf32>
    %408 = vector.shape_cast %407 : vector<8x1x32xf32> to vector<8x32xf32>
    %409 = vector.shape_cast %406 : vector<8x32xf32> to vector<8x1x32xf32>
    tpu.vector_store %arg5[%c0_134, %c7_135, %c0_136], %409 {strides = array<i32>} : memref<8x8x32xf32, #tpu.memory_space<vmem>>, vector<8x1x32xf32>,
    %410 = vector.shape_cast %402 : vector<8x1xi1> to vector<8x1xi1>
    %411 = vector.broadcast %410 : vector<8x1xi1> to vector<8x32xi1>
    %412 = arith.select %411, %399, %361 : vector<8x32xi1>, vector<8x32xf32>
    %413 = vector.shape_cast %402 : vector<8x1xi1> to vector<8x1xi1>
    %414 = vector.broadcast %413 : vector<8x1xi1> to vector<8x32xi1>
    %415 = arith.select %414, %397, %364 : vector<8x32xi1>, vector<8x32xf32>
    %c0_137 = arith.constant 0 : index
    %c0_138 = arith.constant 0 : index
    %416 = vector.load %arg6[%c0_137, %c0_138] : memref<8x32xf32, #tpu.memory_space<vmem>>, vector<8x32xf32>
    tpu.vector_store %arg6[%c0_137, %c0_138], %412 {strides = array<i32>} : memref<8x32xf32, #tpu.memory_space<vmem>>, vector<8x32xf32>,
    %c0_139 = arith.constant 0 : index
    %c0_140 = arith.constant 0 : index
    %417 = vector.load %arg7[%c0_139, %c0_140] : memref<8x32xf32, #tpu.memory_space<vmem>>, vector<8x32xf32>
    tpu.vector_store %arg7[%c0_139, %c0_140], %415 {strides = array<i32>} : memref<8x32xf32, #tpu.memory_space<vmem>>, vector<8x32xf32>,
    return
  }
  func.func @transform_0(%arg0: i32, %arg1: i32) -> (i32, i32, i32) {
    %c0_i32 = arith.constant 0 : i32
    %c0_i32_0 = arith.constant 0 : i32
    return %arg1, %arg0, %c0_i32 : i32, i32, i32
  }
  func.func @transform_1(%arg0: i32, %arg1: i32) -> (i32, i32) {
    %c0_i32 = arith.constant 0 : i32
    %c0_i32_0 = arith.constant 0 : i32
    return %arg0, %c0_i32 : i32, i32
  }
  func.func @transform_2(%arg0: i32, %arg1: i32) -> (i32, i32) {
    %c0_i32 = arith.constant 0 : i32
    %c0_i32_0 = arith.constant 0 : i32
    %c0_i32_1 = arith.constant 0 : i32
    return %c0_i32, %c0_i32_0 : i32, i32
  }
  func.func @transform_3(%arg0: i32, %arg1: i32) -> (i32, i32, i32) {
    %c0_i32 = arith.constant 0 : i32
    %c0_i32_0 = arith.constant 0 : i32
    return %arg0, %arg1, %c0_i32 : i32, i32, i32
  }
}

</mosaic_0001>

<bundles_post_ra>
// kernel: lstm_seq2seq_forward.1
= control target key start
LH: loop header
LB: loop body
LE: loop exit
PB: predicated region body
PF: predicated region fallthrough
CT: control target
= control target key end

     0   :  { %s1455_s12 = smov 0   ;;  %s1457_s13 = smov 0   ;;  %s2017_s0 = inlined_call_operand.vmem [shape: f32[16,8,128], index: 0, kind: input, shape index: {}]   ;;  %s2018_s1 = inlined_call_operand.vmem [shape: s32[8,1], index: 1, kind: input, shape index: {}]   ;;  %s2019_s2 = inlined_call_operand.vmem [shape: f32[32,128], index: 2, kind: input, shape index: {}]   ;;  %s2020_s3 = inlined_call_operand.vmem [shape: f32[8,16,32], index: 3, kind: output, shape index: {}]  }
   0x1   :  { %s1459_s14 = smov 0   ;;  %s1461_s15 = smov 0  }
   0x2   :  { %s1463_s16 = smov 0  }
   0x3 LB: > { %s1264_s17 = sadd.s32 4294967295, %s1428_s16   ;;  %s22_s18 = sadd.s32 1, %s1424_s15  ;;  %s1428_s16 = sphi %s1463_s16, %s13_s16   ;;  %s1424_s15 = sphi %s1461_s15, %s2025_s15   ;;  %s1420_s14 = sphi %s1459_s14, %s2024_s14   ;;  %s1416_s13 = sphi %s1457_s13, %s2023_s13   ;;  %s1412_s12 = sphi %s1455_s12, %s2022_s12  }
   0x4   : > { %p23_p0 = scmp.ge.s32.totalorder %s22_s18, 2  ;;  %s109_s19 = sadd.s32 1, %s1416_s13 }
   0x5   : > { %p119_p1 = scmp.ne.s32.totalorder %s1416_s13, %s1412_s12  ;;  %p120_p2 = scmp.eq.s32.totalorder %s1264_s17, 1 }
   0x6   : > { %s2027_s18 = smov (%p23_p0, %s22_s18), 0  ;;  %p1269_p4 = scmp.ge.s32.totalorder %s1428_s16, 1 }
   0x7   : > { %p1482_p3 = por %p120_p2, %p119_p1  ;;  %s105_s21 = ssub.s32 %s1424_s15, %s2027_s18 }
   0x8   : > { %p166_p5 = scmp.lt.s32.totalorder %s1428_s16, 3  ;;  %p107_p6 = scmp.eq.s32.totalorder %s105_s21, 0 }
   0xa   : > { %p167_p7 = pnand %p1269_p4, %p166_p5 }
   0xb   : > { %s1491_s22 = scalar_select %p107_p6, %s1416_s13, %s109_s19  }
   0xc   : > { %170 = sbr.rel (%p167_p7) target bundleno = 4720 (0x1270), region = 32  ;;  %s193_s23 = sand.u32 (!%p167_p7), 1, %s1412_s12  }
   0xd   : > { %s1493_s24 = sshll.u32 (!%p167_p7), %s1420_s14, 3  ;;  %s1270_s25 = sshll.u32 (!%p167_p7), %s193_s23, 6 }
   0xe   : > { %p197_p8 = scmp.lt.s32.totalorder (!%p167_p7), %s1493_s24, 15  ;;  %s1502_s4 = scalar_lea.vmem (!%p167_p7), [#allocation4], %s1270_s25 }
   0xf   : > { %p1273_p9 = scmp.ne.s32.totalorder (!%p167_p7), %s1420_s14, 0 }
  0x11   : > { %s198_s26 = scalar_select %p197_p8, %s1493_s24, 15 }
  0x12   : > { %213 = sbr.rel (%p1273_p9) target bundleno = 26 (0x1a), region = 36 }
  0x13   : > { %s1272_s27 = sshll.u32 %s198_s26, 3 }
  0x14   : > { %s1500_s30 = scalar_lea.vmem %s2017_s0, %s1272_s27 }
  0x17   : > { %vm214_vm0 = vcmask 261120   ;;  %v1430_v0 = vmov 0.0  }
  0x18   : > { %215 = vst.msk [vmem:[#allocation2] sm:$0xff] %vm214_vm0, %v1430_v0 }
  0x19   : > { %216 = vst.msk [vmem:[#allocation3] sm:$0xff] %vm214_vm0, %v1430_v0 }
  0x1a PF: > { %v220_v1 = vld [vmem:[%s2019_s2 + $0x18] sm:$0xff]  ;;  %v219_v2 = vld [vmem:[%s2019_s2 + $0x10] sm:$0xff]  ;;  %v218_v3 = vld [vmem:[%s2019_s2 + $0x8] sm:$0xff]  ;;  %vm226_vm1 = vcmask 261120   ;;  %s1431_s14 = smov 64   ;;  %s1432_s17 = smov 32   ;;  %v277_v12 = vstv %s1493_s24 }
  0x1b   : > { %242 = vmatpush.msra.mxu0 %v220_v1  ;;  %358 = vmatpush.msra.mxu1 %v220_v1  ;;  %v217_v4 = vld [vmem:[%s2019_s2] sm:$0xff]  ;;  %v1433_v13 = vmov 0   ;;  %s1434_s23 = smov 96   ;;  %v1276_v32 = vld [vmem:[%s1500_s30 + $0x8] sm:$0xff]  ;;  %s389_s25 = sadd.s32 1, %s1493_s24  ;;  %v1278_v54 = vld [vmem:[%s1500_s30 + $0x10] sm:$0xff] }
  0x1c   : > { %467 = vmatpush.msra.mxu2 %v220_v1  ;;  %576 = vmatpush.msra.mxu3 %v220_v1  ;;  %v225_v6 = vld [vmem:[%s1500_s30] sm:$0xff]  ;;  %v390_v36 = vstv %s389_s25  ;;  %s498_s26 = sadd.s32 2, %s1493_s24  ;;  %s607_s27 = sadd.s32 3, %s1493_s24  ;;  %vm325_vm15 = vcmask 253952  }
  0x1d   : > { %243 = vmatpush.msra.mxu0 %v219_v2  ;;  %359 = vmatpush.msra.mxu1 %v219_v2  ;;  %v1523_v11 = vld [vmem:[%s2018_s1] sm:$0xff]  ;;  %v499_v58 = vstv %s498_s26  ;;  %v608_v60 = vstv %s607_s27  ;;  %s716_s28 = sadd.s32 4, %s1493_s24  ;;  %s825_s29 = sadd.s32 5, %s1493_s24 }
  0x1e   : > { %468 = vmatpush.msra.mxu2 %v219_v2  ;;  %577 = vmatpush.msra.mxu3 %v219_v2  ;;  %vm278_vm2 = vcmp.gt.s32.totalorder %v1523_v11, %v277_v12  ;;  %vm391_vm4 = vcmp.gt.s32.totalorder %v1523_v11, %v390_v36  ;;  %vm500_vm6 = vcmp.gt.s32.totalorder %v1523_v11, %v499_v58  ;;  %s934_s5 = sadd.s32 6, %s1493_s24  ;;  %s1043_s6 = sadd.s32 7, %s1493_s24 }
  0x1f   : > { %244 = vmatpush.msra.mxu0 %v218_v3  ;;  %v223_v5 = vld [vmem:[#allocation2] sm:$0xff]  ;;  %360 = vmatpush.msra.mxu1 %v218_v3  ;;  %v279_v14 = vsel %vm278_vm2, 1, %v1433_v13  ;;  %v392_v37 = vsel %vm391_vm4, 1, %v1433_v13  ;;  %v501_v59 = vsel %vm500_vm6, 1, %v1433_v13  ;;  %vm609_vm7 = vcmp.gt.s32.totalorder %v1523_v11, %v608_v60  ;;  %s1123_s8 = scalar_lea.vmem (%p1482_p3), %s2020_s3, %s1493_s24 }
  0x20   : > { %469 = vmatpush.msra.mxu2 %v218_v3  ;;  %578 = vmatpush.msra.mxu3 %v218_v3  ;;  %v224_v10 = vld [vmem:[#allocation3] sm:$0xff]  ;;  %v610_v61 = vsel %vm609_vm7, 1, %v1433_v13 }
  0x21   : > { %245 = vmatpush.msra.mxu0 %v217_v4  ;;  %361 = vmatpush.msra.mxu1 %v217_v4 }
  0x22   : > { %1275 = vmatmul.msk.f32.vlgmr.msra.gmra.mxu0 %vm226_vm1, %v223_v5  ;;  %470 = vmatpush.msra.mxu2 %v217_v4 }
  0x23   : > { %579 = vmatpush.msra.mxu3 %v217_v4  ;;  %685 = vmatpush.msrb.mxu0 %v220_v1 }
  0x24   : > { %794 = vmatpush.msrb.mxu1 %v220_v1  ;;  %903 = vmatpush.msrb.mxu2 %v220_v1 }
  0x25   : > { %686 = vmatpush.msrb.mxu0 %v219_v2  ;;  %1012 = vmatpush.msrb.mxu3 %v220_v1 }
  0x26   : > { %795 = vmatpush.msrb.mxu1 %v219_v2  ;;  %904 = vmatpush.msrb.mxu2 %v219_v2 }
  0x27   : > { %687 = vmatpush.msrb.mxu0 %v218_v3  ;;  %1013 = vmatpush.msrb.mxu3 %v219_v2 }
  0x28   : > { %796 = vmatpush.msrb.mxu1 %v218_v3  ;;  %905 = vmatpush.msrb.mxu2 %v218_v3 }
  0x29   : > { %688 = vmatpush.msrb.mxu0 %v217_v4  ;;  %1014 = vmatpush.msrb.mxu3 %v218_v3 }
  0x2a   : > { %797 = vmatpush.msrb.mxu1 %v217_v4  ;;  %906 = vmatpush.msrb.mxu2 %v217_v4 }
  0x2b   : > { %1015 = vmatpush.msrb.mxu3 %v217_v4  ;;  %1339 = vset.pattern.permute.xlu2 %v1433_v13 }
  0x2c   : > { %1340 = vset.pattern.permute.xlu1 %v1433_v13  ;;  %1341 = vset.pattern.permute.xlu0 %v1433_v13 }
  0x2d   : > { %281 = vperm.xlu2 %1339, %v279_v14  }
  0x35   : > { %334 = vrot.lane.b32.xlu2 %v223_v5, %s1434_s23 }
  0x87   : > { %v1534_v26 = vpop.permute.xlu2 %281 }
  0x88   : > { %vm283_vm3 = vcmp.eq.s32.totalorder %v1534_v26, 1 }
  0x8f   : > { %v335_v28 = vpop.permute.xlu2 %334 }
  0x9f   : > { %v247_v7 = vpop.f32.mrf.mxu0 }
  0xa0   : > { %v250_v8 = vadd.f32 %v247_v7, %v225_v6 }
  0xa2   : > { %1342 = vtanh.f32 %v250_v8  ;;  %v251_v15 = vmul.f32 0.5, %v250_v8 }
  0xa4   : > { %1344 = vtanh.f32 %v251_v15 }
  0xa8   : > { %v1343_v9 = vpop.eup %1342 }
  0xa9   : > { %262 = vrot.lane.b32.xlu0 %v1343_v9, %s1431_s14 }
  0xaa   : > { %v1345_v16 = vpop.eup %1344 }
  0xab   : > { %v253_v17 = vmul.f32 0.5, %v1345_v16  ;;  %v1280_v16 = vld [vmem:[%s1500_s30 + $0x18] sm:$0xff] }
  0xad   : > { %v254_v18 = vadd.f32 0.5, %v253_v17 }
  0xb1   : > { %257 = vrot.lane.b32.xlu0 %v224_v10, %s1432_s17 }
 0x11b   : > { %v263_v19 = vpop.permute.xlu0 %262 }
 0x11c   : > { %v265_v20 = vmul.f32 %v263_v19, %v254_v18 }
 0x11e   : > { %267 = vrot.lane.b32.xlu1 %v265_v20, %s1432_s17 }
 0x123   : > { %v258_v21 = vpop.permute.xlu0 %257 }
 0x124   : > { %v260_v22 = vmul.f32 %v258_v21, %v254_v18 }
 0x190   : > { %v268_v23 = vpop.permute.xlu1 %267 }
 0x191   : > { %v270_v24 = vadd.f32 %v268_v23, %v260_v22 }
 0x193   : > { %1346 = vtanh.f32 %v270_v24  ;;  %v338_v44 = vsel %vm283_vm3, %v270_v24, %v258_v21 }
 0x199   : > { %v1347_v25 = vpop.eup %1346 }
 0x19a   : > { %273 = vrot.lane.b32.xlu1 %v1347_v25, %s1431_s14 }
 0x20c   : > { %v274_v27 = vpop.permute.xlu1 %273 }
 0x20d   : > { %v1536_v29 = vmul.f32 %v274_v27, %v254_v18 }
 0x20f   : > { %v337_v30 = vsel %vm283_vm3, %v1536_v29, %v335_v28 }
 0x210   : > { %342 = vrot.lane.b32.xlu0 %v337_v30, %s1432_s17 }
 0x282   : > { %v343_v31 = vpop.permute.xlu0 %342 }
 0x283   : > { %1277 = vmatmul.msk.f32.vlgmr.msra.gmra.mxu1 %vm226_vm1, %v343_v31 }
 0x300   : > { %v363_v33 = vpop.f32.mrf.mxu1 }
 0x301   : > { %v366_v34 = vadd.f32 %v1276_v32, %v363_v33 }
 0x303   : > { %1348 = vtanh.f32 %v366_v34  ;;  %v367_v38 = vmul.f32 0.5, %v366_v34 }
 0x305   : > { %1350 = vtanh.f32 %v367_v38  ;;  %v1282_v38 = vld [vmem:[%s1500_s30 + $0x20] sm:$0xff] }
 0x309   : > { %v1349_v35 = vpop.eup %1348 }
 0x30a   : > { %374 = vrot.lane.b32.xlu1 %v1349_v35, %s1431_s14 }
 0x30b   : > { %v1351_v39 = vpop.eup %1350 }
 0x30c   : > { %v369_v40 = vmul.f32 0.5, %v1351_v39 }
 0x30e   : > { %v370_v41 = vadd.f32 0.5, %v369_v40 }
 0x310   : > { %v372_v45 = vmul.f32 %v370_v41, %v338_v44 }
 0x312   : > { %394 = vperm.xlu1 %1340, %v392_v37  }
 0x37c   : > { %v375_v42 = vpop.permute.xlu1 %374 }
 0x37d   : > { %v377_v43 = vmul.f32 %v375_v42, %v370_v41  ;;  %v717_v42 = vstv %s716_s28 }
 0x37e   : > { %vm718_vm10 = vcmp.gt.s32.totalorder %v1523_v11, %v717_v42 }
 0x37f   : > { %379 = vrot.lane.b32.xlu2 %v377_v43, %s1432_s17  ;;  %v719_v43 = vsel %vm718_vm10, 1, %v1433_v13 }
 0x384   : > { %v1553_v49 = vpop.permute.xlu1 %394 }
 0x385   : > { %vm396_vm5 = vcmp.eq.s32.totalorder %v1553_v49, 1 }
 0x3d9   : > { %v380_v46 = vpop.permute.xlu2 %379 }
 0x3da   : > { %v382_v47 = vadd.f32 %v380_v46, %v372_v45 }
 0x3dc   : > { %1352 = vtanh.f32 %v382_v47  ;;  %v447_v4 = vsel %vm396_vm5, %v382_v47, %v338_v44 }
 0x3e2   : > { %v1353_v48 = vpop.eup %1352 }
 0x3e3   : > { %385 = vrot.lane.b32.xlu0 %v1353_v48, %s1431_s14 }
 0x455   : > { %v386_v50 = vpop.permute.xlu0 %385 }
 0x456   : > { %v1555_v51 = vmul.f32 %v386_v50, %v370_v41 }
 0x458   : > { %v446_v52 = vsel %vm396_vm5, %v1555_v51, %v337_v30  ;;  %v1663_v26 = vsel %vm396_vm5, %v1555_v51, 0.0 }
 0x459   : > { %451 = vrot.lane.b32.xlu2 %v446_v52, %s1432_s17  ;;  %v405_v42 = vrot.slane %v1663_v26, 7 }
 0x4b3   : > { %v452_v53 = vpop.permute.xlu2 %451 }
 0x4b4   : > { %1279 = vmatmul.msk.f32.vlgmr.msra.gmra.mxu2 %vm226_vm1, %v452_v53 }
 0x537   : > { %v472_v55 = vpop.f32.mrf.mxu2 }
 0x538   : > { %v475_v56 = vadd.f32 %v1278_v54, %v472_v55 }
 0x53a   : > { %1354 = vtanh.f32 %v475_v56  ;;  %v476_v62 = vmul.f32 0.5, %v475_v56 }
 0x53c   : > { %1356 = vtanh.f32 %v476_v62  ;;  %v1284_v62 = vld [vmem:[%s1500_s30 + $0x28] sm:$0xff] }
 0x540   : > { %v1355_v57 = vpop.eup %1354 }
 0x541   : > { %483 = vrot.lane.b32.xlu0 %v1355_v57, %s1431_s14 }
 0x542   : > { %v1357_v63 = vpop.eup %1356 }
 0x543   : > { %v478_v0 = vmul.f32 0.5, %v1357_v63 }
 0x545   : > { %v479_v1 = vadd.f32 0.5, %v478_v0 }
 0x547   : > { %v481_v5 = vmul.f32 %v479_v1, %v447_v4 }
 0x549   : > { %503 = vperm.xlu0 %1341, %v501_v59  }
 0x551   : > { %612 = vperm.xlu0 %1341, %v610_v61  }
 0x5b3   : > { %v484_v2 = vpop.permute.xlu0 %483 }
 0x5b4   : > { %v486_v3 = vmul.f32 %v484_v2, %v479_v1  ;;  %v826_v2 = vstv %s825_s29 }
 0x5b5   : > { %vm827_vm12 = vcmp.gt.s32.totalorder %v1523_v11, %v826_v2 }
 0x5b6   : > { %488 = vrot.lane.b32.xlu1 %v486_v3, %s1432_s17  ;;  %v828_v3 = vsel %vm827_vm12, 1, %v1433_v13 }
 0x5bb   : > { %v1575_v9 = vpop.permute.xlu0 %503 }
 0x5bc   : > { %vm505_vm8 = vcmp.eq.s32.totalorder %v1575_v9, 1 }
 0x5c3   : > { %v1591_v33 = vpop.permute.xlu0 %612 }
 0x5c4   : > { %vm614_vm9 = vcmp.eq.s32.totalorder %v1591_v33, 1 }
 0x628   : > { %v489_v6 = vpop.permute.xlu1 %488 }
 0x629   : > { %v491_v7 = vadd.f32 %v489_v6, %v481_v5 }
 0x62b   : > { %1358 = vtanh.f32 %v491_v7  ;;  %v556_v27 = vsel %vm505_vm8, %v491_v7, %v447_v4 }
 0x631   : > { %v1359_v8 = vpop.eup %1358 }
 0x632   : > { %494 = vrot.lane.b32.xlu2 %v1359_v8, %s1431_s14 }
 0x68c   : > { %v495_v10 = vpop.permute.xlu2 %494 }
 0x68d   : > { %v1577_v12 = vmul.f32 %v495_v10, %v479_v1 }
 0x68f   : > { %v555_v14 = vsel %vm505_vm8, %v1577_v12, %v446_v52 }
 0x690   : > { %560 = vrot.lane.b32.xlu1 %v555_v14, %s1432_s17 }
 0x702   : > { %v561_v15 = vpop.permute.xlu1 %560 }
 0x703   : > { %1281 = vmatmul.msk.f32.vlgmr.msra.gmra.mxu3 %vm226_vm1, %v561_v15 }
 0x786   : > { %v581_v17 = vpop.f32.mrf.mxu3 }
 0x787   : > { %v584_v18 = vadd.f32 %v1280_v16, %v581_v17 }
 0x789   : > { %1360 = vtanh.f32 %v584_v18  ;;  %v585_v20 = vmul.f32 0.5, %v584_v18 }
 0x78b   : > { %1362 = vtanh.f32 %v585_v20 }
 0x78f   : > { %v1361_v19 = vpop.eup %1360 }
 0x790   : > { %592 = vrot.lane.b32.xlu2 %v1361_v19, %s1431_s14 }
 0x791   : > { %v1363_v21 = vpop.eup %1362 }
 0x792   : > { %v587_v22 = vmul.f32 0.5, %v1363_v21 }
 0x794   : > { %v588_v23 = vadd.f32 0.5, %v587_v22 }
 0x796   : > { %v590_v28 = vmul.f32 %v588_v23, %v556_v27 }
 0x7ea   : > { %v593_v24 = vpop.permute.xlu2 %592 }
 0x7eb   : > { %v595_v25 = vmul.f32 %v593_v24, %v588_v23  ;;  %v1286_v24 = vld [vmem:[%s1500_s30 + $0x30] sm:$0xff] }
 0x7ed   : > { %597 = vrot.lane.b32.xlu1 %v595_v25, %s1432_s17 }
 0x85f   : > { %v598_v30 = vpop.permute.xlu1 %597 }
 0x860   : > { %v600_v31 = vadd.f32 %v598_v30, %v590_v28  ;;  %v935_v30 = vstv %s934_s5 }
 0x861   : > { %vm936_vm14 = vcmp.gt.s32.totalorder %v1523_v11, %v935_v30 }
 0x862   : > { %1364 = vtanh.f32 %v600_v31  ;;  %v665_v52 = vsel %vm614_vm9, %v600_v31, %v556_v27  ;;  %v937_v31 = vsel %vm936_vm14, 1, %v1433_v13 }
 0x868   : > { %v1365_v32 = vpop.eup %1364 }
 0x869   : > { %603 = vrot.lane.b32.xlu2 %v1365_v32, %s1431_s14  ;;  %v1653_v32 = vsel %vm283_vm3, %v1536_v29, 0.0  ;;  %v400_v29 = vrot.slane %v1663_v26, 2 }
 0x86a   : > { %v291_v2 = vrot.slane %v1653_v32, 6 }
 0x8c3   : > { %v604_v34 = vpop.permute.xlu2 %603 }
 0x8c4   : > { %v1593_v35 = vmul.f32 %v604_v34, %v588_v23  ;;  %v286_v34 = vrot.slane %v1653_v32, 1 }
 0x8c6   : > { %v664_v36 = vsel %vm614_vm9, %v1593_v35, %v555_v14  ;;  %v1718_v9 = vsel %vm614_vm9, %v1593_v35, 0.0  ;;  %v287_v35 = vrot.slane %v1653_v32, 2 }
 0x8c7   : > { %669 = vrot.lane.b32.xlu1 %v664_v36, %s1432_s17 }
 0x939   : > { %v670_v37 = vpop.permute.xlu1 %669 }
 0x93a   : > { %1283 = vmatmul.msk.f32.vlgmr.msrb.gmra.mxu0 %vm226_vm1, %v670_v37  ;;  %v289_v37 = vrot.slane %v1653_v32, 4 }
 0x9b7   : > { %v690_v39 = vpop.f32.mrf.mxu0 }
 0x9b8   : > { %v693_v40 = vadd.f32 %v1282_v38, %v690_v39  ;;  %v297_v38 = vperm.slane %v289_v37, 0  ;;  %v292_v39 = vrot.slane %v1653_v32, 7 }
 0x9ba   : > { %1366 = vtanh.f32 %v693_v40  ;;  %v694_v44 = vmul.f32 0.5, %v693_v40  ;;  %v300_v40 = vperm.slane %v292_v39, 0  ;;  %v406_v39 = vperm.slane %v1663_v26, 0 }
 0x9bc   : > { %1368 = vtanh.f32 %v694_v44 }
 0x9c0   : > { %v1367_v41 = vpop.eup %1366 }
 0x9c1   : > { %701 = vrot.lane.b32.xlu2 %v1367_v41, %s1431_s14  ;;  %v408_v41 = vperm.slane %v400_v29, 0 }
 0x9c2   : > { %v1369_v45 = vpop.eup %1368 }
 0x9c3   : > { %v696_v46 = vmul.f32 0.5, %v1369_v45 }
 0x9c5   : > { %v697_v47 = vadd.f32 0.5, %v696_v46 }
 0x9c7   : > { %v699_v53 = vmul.f32 %v697_v47, %v665_v52 }
 0x9c9   : > { %721 = vperm.xlu2 %1339, %v719_v43   ;;  %v413_v43 = vperm.slane %v405_v42, 0 }
 0xa1b   : > { %v702_v48 = vpop.permute.xlu2 %701 }
 0xa1c   : > { %v704_v50 = vmul.f32 %v702_v48, %v697_v47 }
 0xa1e   : > { %706 = vrot.lane.b32.xlu0 %v704_v50, %s1432_s17 }
 0xa23   : > { %v1610_v57 = vpop.permute.xlu2 %721 }
 0xa24   : > { %vm723_vm11 = vcmp.eq.s32.totalorder %v1610_v57, 1  ;;  %v1044_v57 = vstv %s1043_s6 }
 0xa25   : > { %vm1045_vm2 = vcmp.gt.s32.totalorder %v1523_v11, %v1044_v57 }
 0xa90   : > { %v707_v54 = vpop.permute.xlu0 %706 }
 0xa91   : > { %v709_v55 = vadd.f32 %v707_v54, %v699_v53 }
 0xa93   : > { %1370 = vtanh.f32 %v709_v55  ;;  %v1628_v14 = vsel %vm723_vm11, %v709_v55, %v665_v52 }
 0xa99   : > { %v1371_v56 = vpop.eup %1370 }
 0xa9a   : > { %712 = vrot.lane.b32.xlu1 %v1371_v56, %s1431_s14 }
 0xb0c   : > { %v713_v58 = vpop.permute.xlu1 %712 }
 0xb0d   : > { %v1612_v59 = vmul.f32 %v713_v58, %v697_v47 }
 0xb0f   : > { %v773_v60 = vsel %vm723_vm11, %v1612_v59, %v664_v36  ;;  %v294_v36 = vperm.slane %v286_v34, 0  ;;  %v295_v34 = vperm.slane %v287_v35, 0 }
 0xb10   : > { %778 = vrot.lane.b32.xlu0 %v773_v60, %s1432_s17 }
 0xb82   : > { %v779_v61 = vpop.permute.xlu0 %778 }
 0xb83   : > { %1285 = vmatmul.msk.f32.vlgmr.msrb.gmra.mxu1 %vm226_vm1, %v779_v61 }
 0xc00   : > { %v799_v63 = vpop.f32.mrf.mxu1 }
 0xc01   : > { %v802_v0 = vadd.f32 %v1284_v62, %v799_v63  ;;  %v293_v63 = vperm.slane %v1653_v32, 0 }
 0xc03   : > { %1372 = vtanh.f32 %v802_v0  ;;  %v803_v4 = vmul.f32 0.5, %v802_v0  ;;  %v288_v0 = vrot.slane %v1653_v32, 3 }
 0xc05   : > { %1374 = vtanh.f32 %v803_v4  ;;  %v399_v4 = vrot.slane %v1663_v26, 1 }
 0xc09   : > { %v1373_v1 = vpop.eup %1372 }
 0xc0a   : > { %810 = vrot.lane.b32.xlu1 %v1373_v1, %s1431_s14  ;;  %v296_v1 = vperm.slane %v288_v0, 0 }
 0xc0b   : > { %v1375_v5 = vpop.eup %1374 }
 0xc0c   : > { %v805_v6 = vmul.f32 0.5, %v1375_v5  ;;  %v407_v5 = vperm.slane %v399_v4, 0 }
 0xc0e   : > { %v806_v7 = vadd.f32 0.5, %v805_v6  ;;  %v402_v6 = vrot.slane %v1663_v26, 4 }
 0xc10   : > { %v808_v15 = vmul.f32 %v806_v7, %v1628_v14 }
 0xc12   : > { %830 = vperm.xlu1 %1340, %v828_v3   ;;  %v299_v3 = vperm.slane %v291_v2, 0 }
 0xc7c   : > { %v811_v8 = vpop.permute.xlu1 %810 }
 0xc7d   : > { %v813_v10 = vmul.f32 %v811_v8, %v806_v7  ;;  %v404_v8 = vrot.slane %v1663_v26, 6 }
 0xc7f   : > { %815 = vrot.lane.b32.xlu2 %v813_v10, %s1432_s17  ;;  %v412_v10 = vperm.slane %v404_v8, 0  ;;  %v1046_v8 = vsel %vm1045_vm2, 1, %v1433_v13 }
 0xc84   : > { %v1632_v19 = vpop.permute.xlu1 %830 }
 0xc85   : > { %vm832_vm13 = vcmp.eq.s32.totalorder %v1632_v19, 1 }
 0xcd9   : > { %v816_v16 = vpop.permute.xlu2 %815 }
 0xcda   : > { %v818_v17 = vadd.f32 %v816_v16, %v808_v15 }
 0xcdc   : > { %1376 = vtanh.f32 %v818_v17  ;;  %v1686_v56 = vsel %vm832_vm13, %v818_v17, %v1628_v14  ;;  %v1707_v14 = vsel %vm505_vm8, %v1577_v12, 0.0  ;;  %v620_v12 = vrot.slane %v1718_v9, 4 }
 0xcdd   : > { %v508_v15 = vrot.slane %v1707_v14, 1  ;;  %v511_v17 = vrot.slane %v1707_v14, 4 }
 0xcdf   : > { %v516_v16 = vperm.slane %v508_v15, 0 }
 0xce2   : > { %v1377_v18 = vpop.eup %1376 }
 0xce3   : > { %821 = vrot.lane.b32.xlu0 %v1377_v18, %s1431_s14  ;;  %v519_v18 = vperm.slane %v511_v17, 0 }
 0xd55   : > { %v822_v20 = vpop.permute.xlu0 %821 }
 0xd56   : > { %v1634_v21 = vmul.f32 %v822_v20, %v806_v7  ;;  %v410_v7 = vperm.slane %v402_v6, 0  ;;  %v514_v20 = vrot.slane %v1707_v14, 7 }
 0xd58   : > { %v1640_v22 = vsel %vm832_vm13, %v1634_v21, %v773_v60 }
 0xd59   : > { %887 = vrot.lane.b32.xlu2 %v1640_v22, %s1432_s17 }
 0xdb3   : > { %v888_v23 = vpop.permute.xlu2 %887 }
 0xdb4   : > { %1287 = vmatmul.msk.f32.vlgmr.msrb.gmra.mxu2 %vm226_vm1, %v888_v23  ;;  %v522_v23 = vperm.slane %v514_v20, 0 }
 0xe37   : > { %v908_v25 = vpop.f32.mrf.mxu2 }
 0xe38   : > { %v911_v27 = vadd.f32 %v1286_v24, %v908_v25  ;;  %v628_v24 = vperm.slane %v620_v12, 0  ;;  %v623_v25 = vrot.slane %v1718_v9, 7 }
 0xe3a   : > { %1378 = vtanh.f32 %v911_v27  ;;  %v912_v44 = vmul.f32 0.5, %v911_v27  ;;  %v631_v27 = vperm.slane %v623_v25, 0 }
 0xe3c   : > { %1380 = vtanh.f32 %v912_v44 }
 0xe40   : > { %v1379_v28 = vpop.eup %1378 }
 0xe41   : > { %919 = vrot.lane.b32.xlu0 %v1379_v28, %s1431_s14 }
 0xe42   : > { %v1381_v49 = vpop.eup %1380 }
 0xe43   : > { %v914_v51 = vmul.f32 0.5, %v1381_v49  ;;  %v515_v49 = vperm.slane %v1707_v14, 0 }
 0xe45   : > { %v915_v45 = vadd.f32 0.5, %v914_v51  ;;  %v510_v51 = vrot.slane %v1707_v14, 3 }
 0xe47   : > { %v917_v58 = vmul.f32 %v915_v45, %v1686_v56 }
 0xe49   : > { %939 = vperm.xlu0 %1341, %v937_v31  }
 0xe51   : > { %303 = vrot.lane.b32.xlu0 %v294_v36, %s1432_s17  ;;  %v290_v36 = vrot.slane %v1653_v32, 5 }
 0xe59   : > { %309 = vrot.lane.b32.xlu0 %v297_v38, %s1432_s17 }
 0xe61   : > { %315 = vrot.lane.b32.xlu0 %v300_v40, %s1432_s17  ;;  %v401_v40 = vrot.slane %v1663_v26, 3 }
 0xe63   : > { %v409_v32 = vperm.slane %v401_v40, 0 }
 0xe69   : > { %418 = vrot.lane.b32.xlu0 %v408_v41, %s1432_s17  ;;  %v403_v41 = vrot.slane %v1663_v26, 5  ;;  %v518_v26 = vperm.slane %v510_v51, 0 }
 0xe71   : > { %428 = vrot.lane.b32.xlu0 %v413_v43, %s1432_s17  ;;  %v411_v43 = vperm.slane %v403_v41, 0  ;;  %v1288_v41 = vld [vmem:[%s1500_s30 + $0x38] sm:$0xff] }
 0xeb3   : > { %v920_v46 = vpop.permute.xlu0 %919 }
 0xeb4   : > { %v922_v47 = vmul.f32 %v920_v46, %v915_v45  ;;  %v513_v46 = vrot.slane %v1707_v14, 6 }
 0xeb6   : > { %924 = vrot.lane.b32.xlu1 %v922_v47, %s1432_s17 }
 0xebb   : > { %v1671_v48 = vpop.permute.xlu0 %939 }
 0xebc   : > { %vm941_vm0 = vcmp.eq.s32.totalorder %v1671_v48, 1 }
 0xec3   : > { %v304_v50 = vpop.permute.xlu0 %303 }
 0xec4   : > { %327 = vst.msk [vmem:[%s1502_s4 + $0x8] sm:$0x1] %vm325_vm15, %v304_v50  ;;  %v521_v50 = vperm.slane %v513_v46, 0 }
 0xecb   : > { %v310_v52 = vpop.permute.xlu0 %309 }
 0xecc   : > { %330 = vst.msk [vmem:[%s1502_s4 + $0x20] sm:$0x1] %vm325_vm15, %v310_v52  ;;  %v617_v52 = vrot.slane %v1718_v9, 1 }
 0xed3   : > { %v316_v53 = vpop.permute.xlu0 %315 }
 0xed4   : > { %333 = vst.msk [vmem:[%s1502_s4 + $0x38] sm:$0x1] %vm325_vm15, %v316_v53 }
 0xedb   : > { %v419_v54 = vpop.permute.xlu0 %418 }
 0xedc   : > { %440 = vst.msk [vmem:[%s1502_s4 + $0x11] sm:$0x1] %vm325_vm15, %v419_v54  ;;  %v625_v54 = vperm.slane %v617_v52, 0 }
 0xee3   : > { %v429_v55 = vpop.permute.xlu0 %428 }
 0xee4   : > { %445 = vst.msk [vmem:[%s1502_s4 + $0x39] sm:$0x1] %vm325_vm15, %v429_v55  ;;  %v619_v55 = vrot.slane %v1718_v9, 3 }
 0xf28   : > { %v925_v60 = vpop.permute.xlu1 %924 }
 0xf29   : > { %v1689_v61 = vadd.f32 %v925_v60, %v917_v58  ;;  %v627_v60 = vperm.slane %v619_v55, 0 }
 0xf2b   : > { %1382 = vtanh.f32 %v1689_v61 }
 0xf31   : > { %v1383_v62 = vpop.eup %1382 }
 0xf32   : > { %930 = vrot.lane.b32.xlu2 %v1383_v62, %s1431_s14  ;;  %v622_v62 = vrot.slane %v1718_v9, 6 }
 0xf34   : > { %v630_v0 = vperm.slane %v622_v62, 0 }
 0xf3a   : > { %301 = vrot.lane.b32.xlu2 %v293_v63, %s1432_s17 }
 0xf42   : > { %307 = vrot.lane.b32.xlu2 %v296_v1, %s1432_s17  ;;  %v1782_v1 = vsel %vm723_vm11, %v1612_v59, 0.0 }
 0xf43   : > { %v726_v2 = vrot.slane %v1782_v1, 1  ;;  %v729_v4 = vrot.slane %v1782_v1, 4  ;;  %v732_v6 = vrot.slane %v1782_v1, 7  ;;  %v728_v62 = vrot.slane %v1782_v1, 3 }
 0xf4a   : > { %313 = vrot.lane.b32.xlu2 %v299_v3, %s1432_s17  ;;  %v734_v3 = vperm.slane %v726_v2, 0 }
 0xf52   : > { %416 = vrot.lane.b32.xlu2 %v407_v5, %s1432_s17  ;;  %v737_v5 = vperm.slane %v729_v4, 0 }
 0xf5a   : > { %422 = vrot.lane.b32.xlu2 %v410_v7, %s1432_s17  ;;  %v740_v7 = vperm.slane %v732_v6, 0 }
 0xf62   : > { %426 = vrot.lane.b32.xlu2 %v412_v10, %s1432_s17  ;;  %v1798_v10 = vsel %vm832_vm13, %v1634_v21, 0.0 }
 0xf63   : > { %v839_v4 = vrot.slane %v1798_v10, 5 }
 0xf6a   : > { %525 = vrot.lane.b32.xlu2 %v516_v16, %s1432_s17  ;;  %v837_v16 = vrot.slane %v1798_v10, 3 }
 0xf6c   : > { %v845_v17 = vperm.slane %v837_v16, 0  ;;  %v727_v16 = vrot.slane %v1782_v1, 2 }
 0xf72   : > { %531 = vrot.lane.b32.xlu2 %v519_v18, %s1432_s17  ;;  %v840_v18 = vrot.slane %v1798_v10, 6 }
 0xf74   : > { %v848_v13 = vperm.slane %v840_v18, 0  ;;  %v730_v18 = vrot.slane %v1782_v1, 5 }
 0xf7a   : > { %537 = vrot.lane.b32.xlu2 %v522_v23, %s1432_s17 }
 0xf82   : > { %640 = vrot.lane.b32.xlu2 %v628_v24, %s1432_s17 }
 0xf8a   : > { %646 = vrot.lane.b32.xlu2 %v631_v27, %s1432_s17 }
 0xf8c   : > { %v931_v28 = vpop.permute.xlu2 %930 }
 0xf8d   : > { %v1725_v30 = vmul.f32 %v931_v28, %v915_v45 }
 0xf8f   : > { %v1732_v33 = vsel %vm941_vm0, %v1725_v30, %v1640_v22  ;;  %v298_v22 = vperm.slane %v290_v36, 0  ;;  %v1810_v19 = vsel %vm941_vm0, %v1725_v30, 0.0 }
 0xf90   : > { %996 = vrot.lane.b32.xlu1 %v1732_v33, %s1432_s17  ;;  %v944_v20 = vrot.slane %v1810_v19, 1  ;;  %v947_v24 = vrot.slane %v1810_v19, 4  ;;  %v950_v28 = vrot.slane %v1810_v19, 7 }
 0xf92   : > { %v952_v23 = vperm.slane %v944_v20, 0  ;;  %v955_v25 = vperm.slane %v947_v24, 0  ;;  %v958_v30 = vperm.slane %v950_v28, 0 }
 0xf94   : > { %v302_v31 = vpop.permute.xlu2 %301 }
 0xf95   : > { %326 = vst.msk [vmem:[%s1502_s4] sm:$0x1] %vm325_vm15, %v302_v31 }
 0xf98   : > { %305 = vrot.lane.b32.xlu1 %v295_v34, %s1432_s17 }
 0xf9c   : > { %v308_v37 = vpop.permute.xlu2 %307 }
 0xf9d   : > { %329 = vst.msk [vmem:[%s1502_s4 + $0x18] sm:$0x1] %vm325_vm15, %v308_v37 }
 0xfa0   : > { %311 = vrot.lane.b32.xlu1 %v298_v22, %s1432_s17 }
 0xfa4   : > { %v314_v38 = vpop.permute.xlu2 %313 }
 0xfa5   : > { %332 = vst.msk [vmem:[%s1502_s4 + $0x30] sm:$0x1] %vm325_vm15, %v314_v38 }
 0xfa8   : > { %414 = vrot.lane.b32.xlu1 %v406_v39, %s1432_s17 }
 0xfac   : > { %v417_v29 = vpop.permute.xlu2 %416 }
 0xfad   : > { %439 = vst.msk [vmem:[%s1502_s4 + $0x9] sm:$0x1] %vm325_vm15, %v417_v29 }
 0xfb0   : > { %420 = vrot.lane.b32.xlu1 %v409_v32, %s1432_s17 }
 0xfb4   : > { %v423_v42 = vpop.permute.xlu2 %422 }
 0xfb5   : > { %442 = vst.msk [vmem:[%s1502_s4 + $0x21] sm:$0x1] %vm325_vm15, %v423_v42 }
 0xfb8   : > { %424 = vrot.lane.b32.xlu1 %v411_v43, %s1432_s17 }
 0xfbc   : > { %v427_v44 = vpop.permute.xlu2 %426 }
 0xfbd   : > { %444 = vst.msk [vmem:[%s1502_s4 + $0x31] sm:$0x1] %vm325_vm15, %v427_v44 }
 0xfc0   : > { %523 = vrot.lane.b32.xlu1 %v515_v49, %s1432_s17 }
 0xfc4   : > { %v526_v45 = vpop.permute.xlu2 %525 }
 0xfc5   : > { %548 = vst.msk [vmem:[%s1502_s4 + $0xa] sm:$0x1] %vm325_vm15, %v526_v45  ;;  %v509_v45 = vrot.slane %v1707_v14, 2 }
 0xfc8   : > { %529 = vrot.lane.b32.xlu1 %v518_v26, %s1432_s17  ;;  %v517_v26 = vperm.slane %v509_v45, 0 }
 0xfcc   : > { %v532_v47 = vpop.permute.xlu2 %531 }
 0xfcd   : > { %551 = vst.msk [vmem:[%s1502_s4 + $0x22] sm:$0x1] %vm325_vm15, %v532_v47  ;;  %v512_v47 = vrot.slane %v1707_v14, 5 }
 0xfd0   : > { %535 = vrot.lane.b32.xlu1 %v521_v50, %s1432_s17  ;;  %v520_v50 = vperm.slane %v512_v47, 0 }
 0xfd4   : > { %v538_v53 = vpop.permute.xlu2 %537 }
 0xfd5   : > { %554 = vst.msk [vmem:[%s1502_s4 + $0x3a] sm:$0x1] %vm325_vm15, %v538_v53  ;;  %v624_v53 = vperm.slane %v1718_v9, 0 }
 0xfd8   : > { %634 = vrot.lane.b32.xlu1 %v625_v54, %s1432_s17  ;;  %v618_v54 = vrot.slane %v1718_v9, 2 }
 0xfda   : > { %v626_v55 = vperm.slane %v618_v54, 0 }
 0xfdc   : > { %v641_v58 = vpop.permute.xlu2 %640 }
 0xfdd   : > { %660 = vst.msk [vmem:[%s1502_s4 + $0x23] sm:$0x1] %vm325_vm15, %v641_v58  ;;  %v621_v58 = vrot.slane %v1718_v9, 5 }
 0xfdf   : > { %v629_v14 = vperm.slane %v621_v58, 0 }
 0xfe0   : > { %638 = vrot.lane.b32.xlu1 %v627_v60, %s1432_s17  ;;  %v733_v60 = vperm.slane %v1782_v1, 0 }
 0xfe4   : > { %v647_v63 = vpop.permute.xlu2 %646 }
 0xfe5   : > { %663 = vst.msk [vmem:[%s1502_s4 + $0x3b] sm:$0x1] %vm325_vm15, %v647_v63  ;;  %v736_v63 = vperm.slane %v728_v62, 0 }
 0xfe8   : > { %644 = vrot.lane.b32.xlu1 %v630_v0, %s1432_s17  ;;  %v731_v0 = vrot.slane %v1782_v1, 6 }
 0xfea   : > { %v739_v2 = vperm.slane %v731_v0, 0 }
 0xff0   : > { %743 = vrot.lane.b32.xlu1 %v734_v3, %s1432_s17  ;;  %v836_v3 = vrot.slane %v1798_v10, 2 }
 0xff2   : > { %v844_v9 = vperm.slane %v836_v3, 0 }
 0xff8   : > { %749 = vrot.lane.b32.xlu1 %v737_v5, %s1432_s17  ;;  %v847_v5 = vperm.slane %v839_v4, 0 }
0x1000   : > { %755 = vrot.lane.b32.xlu1 %v740_v7, %s1432_s17 }
0x1002   : > { %v997_v59 = vpop.permute.xlu1 %996 }
0x1003   : > { %1289 = vmatmul.msk.f32.vlgmr.msrb.gmra.mxu3 %vm226_vm1, %v997_v59 }
0x1008   : > { %1048 = vperm.xlu1 %1340, %v1046_v8  }
0x100a   : > { %v306_v15 = vpop.permute.xlu1 %305 }
0x100b   : > { %328 = vst.msk [vmem:[%s1502_s4 + $0x10] sm:$0x1] %vm325_vm15, %v306_v15 }
0x1010   : > { %856 = vrot.lane.b32.xlu1 %v845_v17, %s1432_s17 }
0x1012   : > { %v312_v11 = vpop.permute.xlu1 %311 }
0x1013   : > { %331 = vst.msk [vmem:[%s1502_s4 + $0x28] sm:$0x1] %vm325_vm15, %v312_v11  ;;  %v735_v11 = vperm.slane %v727_v16, 0 }
0x1018   : > { %862 = vrot.lane.b32.xlu1 %v848_v13, %s1432_s17 }
0x101a   : > { %v415_v21 = vpop.permute.xlu1 %414 }
0x101b   : > { %438 = vst.msk [vmem:[%s1502_s4 + $0x1] sm:$0x1] %vm325_vm15, %v415_v21  ;;  %v738_v21 = vperm.slane %v730_v18, 0 }
0x1020   : > { %961 = vrot.lane.b32.xlu1 %v952_v23, %s1432_s17  ;;  %v842_v23 = vperm.slane %v1798_v10, 0 }
0x1022   : > { %v421_v12 = vpop.permute.xlu1 %420 }
0x1023   : > { %441 = vst.msk [vmem:[%s1502_s4 + $0x19] sm:$0x1] %vm325_vm15, %v421_v12  ;;  %v835_v12 = vrot.slane %v1798_v10, 1 }
0x1025   : > { %v843_v1 = vperm.slane %v835_v12, 0 }
0x1028   : > { %967 = vrot.lane.b32.xlu1 %v955_v25, %s1432_s17  ;;  %v838_v25 = vrot.slane %v1798_v10, 4 }
0x102a   : > { %v425_v27 = vpop.permute.xlu1 %424  ;;  %v846_v28 = vperm.slane %v838_v25, 0 }
0x102b   : > { %443 = vst.msk [vmem:[%s1502_s4 + $0x29] sm:$0x1] %vm325_vm15, %v425_v27 }
0x1030   : > { %973 = vrot.lane.b32.xlu1 %v958_v30, %s1432_s17  ;;  %v841_v30 = vrot.slane %v1798_v10, 7 }
0x1032   : > { %v524_v35 = vpop.permute.xlu1 %523 }
0x1033   : > { %547 = vst.msk [vmem:[%s1502_s4 + $0x2] sm:$0x1] %vm325_vm15, %v524_v35 }
0x103a   : > { %v530_v31 = vpop.permute.xlu1 %529 }
0x103b   : > { %550 = vst.msk [vmem:[%s1502_s4 + $0x1a] sm:$0x1] %vm325_vm15, %v530_v31  ;;  %v849_v31 = vperm.slane %v841_v30, 0 }
0x1042   : > { %v536_v34 = vpop.permute.xlu1 %535 }
0x1043   : > { %553 = vst.msk [vmem:[%s1502_s4 + $0x32] sm:$0x1] %vm325_vm15, %v536_v34  ;;  %v945_v34 = vrot.slane %v1810_v19, 2 }
0x104a   : > { %v635_v36 = vpop.permute.xlu1 %634 }
0x104b   : > { %657 = vst.msk [vmem:[%s1502_s4 + $0xb] sm:$0x1] %vm325_vm15, %v635_v36 }
0x1052   : > { %v639_v37 = vpop.permute.xlu1 %638 }
0x1053   : > { %659 = vst.msk [vmem:[%s1502_s4 + $0x1b] sm:$0x1] %vm325_vm15, %v639_v37  ;;  %v953_v37 = vperm.slane %v945_v34, 0 }
0x105a   : > { %v645_v22 = vpop.permute.xlu1 %644 }
0x105b   : > { %662 = vst.msk [vmem:[%s1502_s4 + $0x33] sm:$0x1] %vm325_vm15, %v645_v22  ;;  %v948_v22 = vrot.slane %v1810_v19, 5 }
0x105d   : > { %v956_v10 = vperm.slane %v948_v22, 0 }
0x1062   : > { %v744_v38 = vpop.permute.xlu1 %743 }
0x1063   : > { %766 = vst.msk [vmem:[%s1502_s4 + $0xc] sm:$0x1] %vm325_vm15, %v744_v38 }
0x106a   : > { %v750_v39 = vpop.permute.xlu1 %749 }
0x106b   : > { %769 = vst.msk [vmem:[%s1502_s4 + $0x24] sm:$0x1] %vm325_vm15, %v750_v39 }
0x1072   : > { %v756_v40 = vpop.permute.xlu1 %755 }
0x1073   : > { %772 = vst.msk [vmem:[%s1502_s4 + $0x3c] sm:$0x1] %vm325_vm15, %v756_v40 }
0x107a   : > { %v1843_v29 = vpop.permute.xlu1 %1048 }
0x107b   : > { %vm1050_vm3 = vcmp.eq.s32.totalorder %v1843_v29, 1 }
0x1082   : > { %v857_v32 = vpop.permute.xlu1 %856 }
0x1083   : > { %877 = vst.msk [vmem:[%s1502_s4 + $0x1d] sm:$0x1] %vm325_vm15, %v857_v32  ;;  %v992_v32 = vsel %vm941_vm0, %v1689_v61, %v1686_v56  ;;  %v951_v56 = vperm.slane %v1810_v19, 0  ;;  %v946_v61 = vrot.slane %v1810_v19, 3 }
0x1086   : > { %v1017_v42 = vpop.f32.mrf.mxu3 }
0x1087   : > { %v1020_v43 = vadd.f32 %v1288_v41, %v1017_v42 }
0x1089   : > { %1384 = vtanh.f32 %v1020_v43  ;;  %v1021_v6 = vmul.f32 0.5, %v1020_v43 }
0x108a   : > { %v863_v44 = vpop.permute.xlu1 %862 }
0x108b   : > { %880 = vst.msk [vmem:[%s1502_s4 + $0x35] sm:$0x1] %vm325_vm15, %v863_v44  ;;  %1386 = vtanh.f32 %v1021_v6 }
0x108f   : > { %v1385_v49 = vpop.eup %1384 }
0x1090   : > { %1028 = vrot.lane.b32.xlu0 %v1385_v49, %s1431_s14 }
0x1091   : > { %v1387_v7 = vpop.eup %1386 }
0x1092   : > { %v962_v51 = vpop.permute.xlu1 %961  ;;  %v1023_v57 = vmul.f32 0.5, %v1387_v7 }
0x1093   : > { %984 = vst.msk [vmem:[%s1502_s4 + $0xe] sm:$0x1] %vm325_vm15, %v962_v51 }
0x1094   : > { %v1877_v59 = vadd.f32 0.5, %v1023_v57 }
0x1096   : > { %v1026_v41 = vmul.f32 %v1877_v59, %v992_v32 }
0x1098   : > { %527 = vrot.lane.b32.xlu0 %v517_v26, %s1432_s17  ;;  %v954_v26 = vperm.slane %v946_v61, 0 }
0x109a   : > { %v968_v46 = vpop.permute.xlu1 %967 }
0x109b   : > { %987 = vst.msk [vmem:[%s1502_s4 + $0x26] sm:$0x1] %vm325_vm15, %v968_v46  ;;  %v949_v46 = vrot.slane %v1810_v19, 6 }
0x10a0   : > { %533 = vrot.lane.b32.xlu0 %v520_v50, %s1432_s17  ;;  %v957_v50 = vperm.slane %v949_v46, 0 }
0x10a2   : > { %v974_v52 = vpop.permute.xlu1 %973 }
0x10a3   : > { %990 = vst.msk [vmem:[%s1502_s4 + $0x3e] sm:$0x1] %vm325_vm15, %v974_v52 }
0x10a8   : > { %632 = vrot.lane.b32.xlu0 %v624_v53, %s1432_s17 }
0x10b0   : > { %636 = vrot.lane.b32.xlu0 %v626_v55, %s1432_s17 }
0x10b8   : > { %642 = vrot.lane.b32.xlu0 %v629_v14, %s1432_s17 }
0x10c0   : > { %741 = vrot.lane.b32.xlu0 %v733_v60, %s1432_s17 }
0x10c8   : > { %747 = vrot.lane.b32.xlu0 %v736_v63, %s1432_s17 }
0x10d0   : > { %753 = vrot.lane.b32.xlu0 %v739_v2, %s1432_s17 }
0x10d8   : > { %854 = vrot.lane.b32.xlu0 %v844_v9, %s1432_s17 }
0x10e0   : > { %860 = vrot.lane.b32.xlu0 %v847_v5, %s1432_s17 }
0x1102   : > { %v1029_v8 = vpop.permute.xlu0 %1028 }
0x1103   : > { %v1031_v15 = vmul.f32 %v1029_v8, %v1877_v59 }
0x1105   : > { %1033 = vrot.lane.b32.xlu2 %v1031_v15, %s1432_s17 }
0x110a   : > { %v528_v17 = vpop.permute.xlu0 %527 }
0x110b   : > { %549 = vst.msk [vmem:[%s1502_s4 + $0x12] sm:$0x1] %vm325_vm15, %v528_v17 }
0x110d   : > { %745 = vrot.lane.b32.xlu2 %v735_v11, %s1432_s17 }
0x1112   : > { %v534_v13 = vpop.permute.xlu0 %533 }
0x1113   : > { %552 = vst.msk [vmem:[%s1502_s4 + $0x2a] sm:$0x1] %vm325_vm15, %v534_v13 }
0x1115   : > { %751 = vrot.lane.b32.xlu2 %v738_v21, %s1432_s17 }
0x111a   : > { %v633_v20 = vpop.permute.xlu0 %632 }
0x111b   : > { %656 = vst.msk [vmem:[%s1502_s4 + $0x3] sm:$0x1] %vm325_vm15, %v633_v20 }
0x111d   : > { %850 = vrot.lane.b32.xlu2 %v842_v23, %s1432_s17 }
0x1122   : > { %v637_v24 = vpop.permute.xlu0 %636 }
0x1123   : > { %658 = vst.msk [vmem:[%s1502_s4 + $0x13] sm:$0x1] %vm325_vm15, %v637_v24 }
0x1125   : > { %852 = vrot.lane.b32.xlu2 %v843_v1, %s1432_s17 }
0x112a   : > { %v643_v27 = vpop.permute.xlu0 %642 }
0x112b   : > { %661 = vst.msk [vmem:[%s1502_s4 + $0x2b] sm:$0x1] %vm325_vm15, %v643_v27 }
0x112d   : > { %858 = vrot.lane.b32.xlu2 %v846_v28, %s1432_s17 }
0x1132   : > { %v742_v35 = vpop.permute.xlu0 %741 }
0x1133   : > { %765 = vst.msk [vmem:[%s1502_s4 + $0x4] sm:$0x1] %vm325_vm15, %v742_v35 }
0x1135   : > { %864 = vrot.lane.b32.xlu2 %v849_v31, %s1432_s17 }
0x113a   : > { %v748_v36 = vpop.permute.xlu0 %747 }
0x113b   : > { %768 = vst.msk [vmem:[%s1502_s4 + $0x1c] sm:$0x1] %vm325_vm15, %v748_v36 }
0x113d   : > { %963 = vrot.lane.b32.xlu2 %v953_v37, %s1432_s17 }
0x1142   : > { %v754_v38 = vpop.permute.xlu0 %753 }
0x1143   : > { %771 = vst.msk [vmem:[%s1502_s4 + $0x34] sm:$0x1] %vm325_vm15, %v754_v38 }
0x1145   : > { %969 = vrot.lane.b32.xlu2 %v956_v10, %s1432_s17 }
0x114a   : > { %v855_v39 = vpop.permute.xlu0 %854 }
0x114b   : > { %876 = vst.msk [vmem:[%s1502_s4 + $0x15] sm:$0x1] %vm325_vm15, %v855_v39 }
0x1152   : > { %v861_v40 = vpop.permute.xlu0 %860 }
0x1153   : > { %879 = vst.msk [vmem:[%s1502_s4 + $0x2d] sm:$0x1] %vm325_vm15, %v861_v40 }
0x115f   : > { %v1034_v42 = vpop.permute.xlu2 %1033 }
0x1160   : > { %v1036_v43 = vadd.f32 %v1034_v42, %v1026_v41 }
0x1162   : > { %1388 = vtanh.f32 %v1036_v43  ;;  %v1101_v44 = vsel %vm1050_vm3, %v1036_v43, %v992_v32 }
0x1167   : > { %v746_v49 = vpop.permute.xlu2 %745 }
0x1168   : > { %v1389_v51 = vpop.eup %1388  ;;  %767 = vst.msk [vmem:[%s1502_s4 + $0x14] sm:$0x1] %vm325_vm15, %v746_v49 }
0x1169   : > { %1039 = vrot.lane.b32.xlu0 %v1389_v51, %s1431_s14 }
0x116f   : > { %v752_v48 = vpop.permute.xlu2 %751 }
0x1170   : > { %770 = vst.msk [vmem:[%s1502_s4 + $0x2c] sm:$0x1] %vm325_vm15, %v752_v48 }
0x1171   : > { %959 = vrot.lane.b32.xlu0 %v951_v56, %s1432_s17 }
0x1177   : > { %v851_v45 = vpop.permute.xlu2 %850 }
0x1178   : > { %874 = vst.msk [vmem:[%s1502_s4 + $0x5] sm:$0x1] %vm325_vm15, %v851_v45 }
0x1179   : > { %965 = vrot.lane.b32.xlu0 %v954_v26, %s1432_s17 }
0x117f   : > { %v853_v47 = vpop.permute.xlu2 %852 }
0x1180   : > { %875 = vst.msk [vmem:[%s1502_s4 + $0xd] sm:$0x1] %vm325_vm15, %v853_v47 }
0x1181   : > { %971 = vrot.lane.b32.xlu0 %v957_v50, %s1432_s17 }
0x1187   : > { %v859_v52 = vpop.permute.xlu2 %858 }
0x1188   : > { %878 = vst.msk [vmem:[%s1502_s4 + $0x25] sm:$0x1] %vm325_vm15, %v859_v52 }
0x118f   : > { %v865_v53 = vpop.permute.xlu2 %864 }
0x1190   : > { %881 = vst.msk [vmem:[%s1502_s4 + $0x3d] sm:$0x1] %vm325_vm15, %v865_v53 }
0x1197   : > { %v964_v54 = vpop.permute.xlu2 %963 }
0x1198   : > { %985 = vst.msk [vmem:[%s1502_s4 + $0x16] sm:$0x1] %vm325_vm15, %v964_v54 }
0x119f   : > { %v970_v55 = vpop.permute.xlu2 %969 }
0x11a0   : > { %988 = vst.msk [vmem:[%s1502_s4 + $0x2e] sm:$0x1] %vm325_vm15, %v970_v55 }
0x11db   : > { %v1040_v19 = vpop.permute.xlu0 %1039 }
0x11dc   : > { %v1042_v58 = vmul.f32 %v1040_v19, %v1877_v59 }
0x11de   : > { %v1051_v14 = vsel %vm1050_vm3, %v1042_v58, 0.0  ;;  %v1100_v11 = vsel %vm1050_vm3, %v1042_v58, %v1732_v33 }
0x11df   : > { %v1060_v60 = vperm.slane %v1051_v14, 0  ;;  %v1054_v62 = vrot.slane %v1051_v14, 2  ;;  %v1053_v63 = vrot.slane %v1051_v14, 1  ;;  %v1055_v9 = vrot.slane %v1051_v14, 3 }
0x11e0   : > { %v1057_v4 = vrot.slane %v1051_v14, 5  ;;  %v1056_v5 = vrot.slane %v1051_v14, 4  ;;  %v1058_v8 = vrot.slane %v1051_v14, 6  ;;  %v1059_v15 = vrot.slane %v1051_v14, 7 }
0x11e1   : > { %1068 = vrot.lane.b32.xlu2 %v1060_v60, %s1432_s17  ;;  %v1062_v0 = vperm.slane %v1054_v62, 0  ;;  %v1061_v2 = vperm.slane %v1053_v63, 0  ;;  %v1063_v6 = vperm.slane %v1055_v9, 0 }
0x11e2   : > { %v1065_v7 = vperm.slane %v1057_v4, 0  ;;  %v1064_v57 = vperm.slane %v1056_v5, 0  ;;  %v1066_v16 = vperm.slane %v1058_v8, 0  ;;  %v1067_v17 = vperm.slane %v1059_v15, 0 }
0x11e3   : > { %1072 = vrot.lane.b32.xlu1 %v1062_v0, %s1432_s17  ;;  %1070 = vrot.lane.b32.xlu0 %v1061_v2, %s1432_s17  ;;  %v960_v3 = vpop.permute.xlu0 %959 }
0x11e4   : > { %983 = vst.msk [vmem:[%s1502_s4 + $0x6] sm:$0x1] %vm325_vm15, %v960_v3 }
0x11e9   : > { %1074 = vrot.lane.b32.xlu2 %v1063_v6, %s1432_s17 }
0x11eb   : > { %1078 = vrot.lane.b32.xlu1 %v1065_v7, %s1432_s17  ;;  %1076 = vrot.lane.b32.xlu0 %v1064_v57, %s1432_s17  ;;  %v966_v59 = vpop.permute.xlu0 %965 }
0x11ec   : > { %986 = vst.msk [vmem:[%s1502_s4 + $0x1e] sm:$0x1] %vm325_vm15, %v966_v59 }
0x11f1   : > { %1080 = vrot.lane.b32.xlu2 %v1066_v16, %s1432_s17 }
0x11f3   : > { %1103 = vrot.lane.b32.xlu1 %v1100_v11, %s1432_s17  ;;  %1082 = vrot.lane.b32.xlu0 %v1067_v17, %s1432_s17  ;;  %v972_v18 = vpop.permute.xlu0 %971 }
0x11f4   : > { %989 = vst.msk [vmem:[%s1502_s4 + $0x36] sm:$0x1] %vm325_vm15, %v972_v18 }
0x11f9   : > { %1108 = vrot.lane.b32.xlu2 %v1101_v44, %s1434_s23 }
0x123b   : > { %v1069_v13 = vpop.permute.xlu2 %1068 }
0x123c   : > { %1092 = vst.msk [vmem:[%s1502_s4 + $0x7] sm:$0x1] %vm325_vm15, %v1069_v13 }
0x1243   : > { %v1075_v21 = vpop.permute.xlu2 %1074  ;;  %v1166_v27 = vld [vmem:[%s1502_s4] sm:$0xff] (%p1482_p3) }
0x1244   : > { %1095 = vst.msk [vmem:[%s1502_s4 + $0x1f] sm:$0x1] %vm325_vm15, %v1075_v21 }
0x1245   : > { %1167 = vst [vmem:[%s1123_s8] sm:$0xff] (%p1482_p3), %v1166_v27 }
0x124b   : > { %v1081_v33 = vpop.permute.xlu2 %1080  ;;  %v1172_v35 = vld [vmem:[%s1502_s4 + $0x18] sm:$0xff] (%p1482_p3) }
0x124c   : > { %1098 = vst.msk [vmem:[%s1502_s4 + $0x37] sm:$0x1] %vm325_vm15, %v1081_v33 }
0x124d   : > { %1173 = vst [vmem:[%s1123_s8 + $0x30] sm:$0xff] (%p1482_p3), %v1172_v35 }
0x1253   : > { %v1109_v29 = vpop.permute.xlu2 %1108  ;;  %v1178_v36 = vld [vmem:[%s1502_s4 + $0x30] sm:$0xff] (%p1482_p3) }
0x1254   : > { %1111 = vst.msk [vmem:[#allocation3] sm:$0xff] %vm226_vm1, %v1109_v29 }
0x1255   : > { %v1073_v20 = vpop.permute.xlu1 %1072  ;;  %v1071_v23 = vpop.permute.xlu0 %1070  ;;  %1179 = vst [vmem:[%s1123_s8 + $0x60] sm:$0xff] (%p1482_p3), %v1178_v36 }
0x1256   : > { %1094 = vst.msk [vmem:[%s1502_s4 + $0x17] sm:$0x1] %vm325_vm15, %v1073_v20 }
0x1257   : > { %1093 = vst.msk [vmem:[%s1502_s4 + $0xf] sm:$0x1] %vm325_vm15, %v1071_v23 }
0x125d   : > { %v1079_v12 = vpop.permute.xlu1 %1078  ;;  %v1077_v24 = vpop.permute.xlu0 %1076  ;;  %v1170_v30 = vld [vmem:[%s1502_s4 + $0x10] sm:$0xff] (%p1482_p3) }
0x125e   : > { %1097 = vst.msk [vmem:[%s1502_s4 + $0x2f] sm:$0x1] %vm325_vm15, %v1079_v12  ;;  %v1168_v28 = vld [vmem:[%s1502_s4 + $0x8] sm:$0xff] (%p1482_p3) }
0x125f   : > { %1096 = vst.msk [vmem:[%s1502_s4 + $0x27] sm:$0x1] %vm325_vm15, %v1077_v24 }
0x1260   : > { %1169 = vst [vmem:[%s1123_s8 + $0x10] sm:$0xff] (%p1482_p3), %v1168_v28 }
0x1261   : > { %1171 = vst [vmem:[%s1123_s8 + $0x20] sm:$0xff] (%p1482_p3), %v1170_v30 }
0x1263   : > { %1118 = sbr.rel (!%p1482_p3) target bundleno = 4720 (0x1270), region = 40 }
0x1265   : > { %v1104_v1 = vpop.permute.xlu1 %1103  ;;  %v1083_v25 = vpop.permute.xlu0 %1082  ;;  %v1176_v34 = vld [vmem:[%s1502_s4 + $0x28] sm:$0xff] (%p1482_p3) }
0x1266   : > { %1106 = vst.msk [vmem:[#allocation2] sm:$0xff] %vm226_vm1, %v1104_v1  ;;  %v1174_v31 = vld [vmem:[%s1502_s4 + $0x20] sm:$0xff] (%p1482_p3) }
0x1267   : > { %1099 = vst.msk [vmem:[%s1502_s4 + $0x3f] sm:$0x1] %vm325_vm15, %v1083_v25 }
0x1268   : > { %1175 = vst [vmem:[%s1123_s8 + $0x40] sm:$0xff] %v1174_v31 }
0x1269   : > { %1177 = vst [vmem:[%s1123_s8 + $0x50] sm:$0xff] %v1176_v34 }
0x126e   : > { %v1180_v37 = vld [vmem:[%s1502_s4 + $0x38] sm:$0xff] }
0x126f   : > { %1181 = vst [vmem:[%s1123_s8 + $0x70] sm:$0xff] %v1180_v37 }
0x1270 PF: > { %s13_s16 = sadd.s32 1, %s1428_s16   ;;  %s2022_s12 = smov %s1416_s13 }
0x1271   : > { %p10_p10 = scmp.ge.s32.totalorder %s13_s16, 4   ;;  %s2023_s13 = smov %s1491_s22 }
0x1272   : > { %s2024_s14 = smov %s1424_s15  ;;  %s2025_s15 = smov %s2027_s18 }
0x1273   :  { %12 = sbr.rel (!%p10_p10) target bundleno = 3 (0x3), region = 114 }

</bundles_post_ra>
